<compile_context>
chip_gen: v5e
topology: v5e:2x2
jax: 0.10.0
libtpu: 0.0.40
codegen_flags: <defaults>
</compile_context>

<pallas_src>
import math

import jax
import jax.numpy as jnp
import numpy as np
from jax.experimental import pallas as pl
from jax.experimental.pallas import tpu as pltpu

# ---------------- config (small, consistent with the module) ----------------
BATCH = 2
SEQ = 8          # decoder sequence length (== config.seq_len)
ENC_SEQ = 8      # encoder sequence length for cross attention
EMBED = 32       # config.embed_dim
N_HEADS = 4      # config.num_heads
HEAD = EMBED // N_HEADS
MLP_RATIO = 4    # config.mlp_ratio
LN_EPS = 1e-5


# ----------------------------- kernel helpers --------------------------------
def _layernorm(x, g, b):
    # x: (T, C); g, b: (1, C)
    mu = jnp.mean(x, axis=-1, keepdims=True)
    var = jnp.mean((x - mu) ** 2, axis=-1, keepdims=True)
    return (x - mu) * jax.lax.rsqrt(var + LN_EPS) * g + b


def _gelu_exact(x):
    # nn.GELU() default: exact erf formulation
    return 0.5 * x * (1.0 + jax.lax.erf(x * (1.0 / math.sqrt(2.0))))


def _mha(xq, xkv, wq, bq, wk, bk, wv, bv, wo, bo, causal):
    """Multi-head attention with per-head weight stacks.

    xq: (Tq, C), xkv: (Tk, C)
    wq/wk/wv: refs (H, C, D); bq/bk/bv: refs (H, 1, D)
    wo: ref (H, D, C); bo: ref (1, C)
    Returns (Tq, C).  No in-kernel lane-granularity slices or concatenates.
    """
    tq = xq.shape[0]
    tk = xkv.shape[0]
    scale = HEAD ** (-0.5)

    if causal:
        row = jax.lax.broadcasted_iota(jnp.int32, (tq, tk), 0)
        col = jax.lax.broadcasted_iota(jnp.int32, (tq, tk), 1)
        mask = row >= col

    acc = None
    for h in range(N_HEADS):  # static, small head count
        qh = (jnp.dot(xq, wq[h], preferred_element_type=jnp.float32) + bq[h]) * scale
        kh = jnp.dot(xkv, wk[h], preferred_element_type=jnp.float32) + bk[h]
        vh = jnp.dot(xkv, wv[h], preferred_element_type=jnp.float32) + bv[h]

        s = jnp.dot(qh, kh.T, preferred_element_type=jnp.float32)
        if causal:
            s = jnp.where(mask, s, -jnp.inf)

        m = jnp.max(s, axis=-1, keepdims=True)
        e = jnp.exp(s - m)
        # EUP approximate reciprocal instead of a VALU divide.
        p = e * pl.reciprocal(jnp.sum(e, axis=-1, keepdims=True), approx=True)

        oh = jnp.dot(p, vh, preferred_element_type=jnp.float32)
        contrib = jnp.dot(oh, wo[h], preferred_element_type=jnp.float32)
        acc = contrib if acc is None else acc + contrib

    return acc + bo[...]


# --------------------------------- kernel ------------------------------------
def gpt2_block_kernel(
    x_ref, enc_ref,
    ln1_g, ln1_b, wq, bq, wk, bk, wv, bv, wo, bo,
    ln2_g, ln2_b, cwq, cbq, cwk, cbk, cwv, cbv, cwo, cbo,
    ln3_g, ln3_b, fc_w, fc_b, mp_w, mp_b,
    out_ref,
):
    x = x_ref[0]          # (T, C)
    enc = enc_ref[0]      # (Te, C)

    # ---- self attention: x = x + attn(ln_1(x)) ----
    h1 = _layernorm(x, ln1_g[...], ln1_b[...])
    att = _mha(h1, h1, wq, bq, wk, bk, wv, bv, wo, bo, causal=True)
    # TODO(synk): attn_dropout / resid_dropout are identity (eval mode)
    x = x + att

    # ---- cross attention: x = x + cross_attn(ln_2(x), enc, enc) ----
    h2 = _layernorm(x, ln2_g[...], ln2_b[...])
    catt = _mha(h2, enc, cwq, cbq, cwk, cbk, cwv, cbv, cwo, cbo, causal=False)
    x = x + catt

    # ---- MLP: x = x + mlp(ln_3(x)) ----
    h3 = _layernorm(x, ln3_g[...], ln3_b[...])
    m = jnp.dot(h3, fc_w[...], preferred_element_type=jnp.float32) + fc_b[...]
    m = _gelu_exact(m)
    m = jnp.dot(m, mp_w[...], preferred_element_type=jnp.float32) + mp_b[...]
    x = x + m

    out_ref[0] = x.astype(out_ref.dtype)


# -------------------------------- wrapper -------------------------------------
def gpt2_block(x, enc_out, params):
    B, T, C = x.shape
    Te = enc_out.shape[1]
    H, D = N_HEADS, HEAD

    (ln1_g, ln1_b, attn_w, attn_b, aproj_w, aproj_b,
     ln2_g, ln2_b, cq_w, cq_b, ck_w, ck_b, cv_w, cv_b, cproj_w, cproj_b,
     ln3_g, ln3_b, fc_w, fc_b, mproj_w, mproj_b) = params

    # --- split fused/column-grouped weights into per-head stacks (wrapper-side,
    # --- so no lane-granularity slicing happens inside the kernel) ---
    def per_head_in(w):      # (C, C) -> (H, C, D): column h*D+d -> [h, :, d]
        return w.reshape(C, H, D).transpose(1, 0, 2)

    def per_head_bias(b):    # (1, C) -> (H, 1, D)
        return b.reshape(H, 1, D)

    def per_head_out(w):     # (C, C) -> (H, D, C): row h*D+d -> [h, d, :]
        return w.reshape(H, D, C)

    wq = per_head_in(attn_w[:, :C]);        bq = per_head_bias(attn_b[:, :C])
    wk = per_head_in(attn_w[:, C:2 * C]);   bk = per_head_bias(attn_b[:, C:2 * C])
    wv = per_head_in(attn_w[:, 2 * C:]);    bv = per_head_bias(attn_b[:, 2 * C:])
    wo = per_head_out(aproj_w);             bo = aproj_b

    cwq = per_head_in(cq_w);    cbq = per_head_bias(cq_b)
    cwk = per_head_in(ck_w);    cbk = per_head_bias(ck_b)
    cwv = per_head_in(cv_w);    cbv = per_head_bias(cv_b)
    cwo = per_head_out(cproj_w); cbo = cproj_b

    param_list = [
        ln1_g, ln1_b, wq, bq, wk, bk, wv, bv, wo, bo,
        ln2_g, ln2_b, cwq, cbq, cwk, cbk, cwv, cbv, cwo, cbo,
        ln3_g, ln3_b, fc_w, fc_b, mproj_w, mproj_b,
    ]

    in_specs = [
        pl.BlockSpec((1, T, C), lambda b: (b, 0, 0)),
        pl.BlockSpec((1, Te, C), lambda b: (b, 0, 0)),
    ]
    for p in param_list:
        in_specs.append(pl.BlockSpec(p.shape, lambda b, n=p.ndim: (0,) * n))

    # --- advisory cost estimate (tiny, latency-bound kernel) ---
    self_macs = H * (3 * T * C * D + 2 * T * T * D + T * D * C)
    cross_macs = H * (T * C * D + 2 * Te * C * D + 2 * T * Te * D + T * D * C)
    mlp_macs = 2 * T * C * (C * MLP_RATIO)
    flops = 2 * B * (self_macs + cross_macs + mlp_macs)
    transcendentals = B * (H * (T * T + T * Te) + T * C * MLP_RATIO + 3 * T)
    bytes_accessed = 4 * (2 * x.size + enc_out.size
                          + sum(int(np.prod(p.shape)) for p in param_list))

    return pl.pallas_call(
        gpt2_block_kernel,
        out_shape=jax.ShapeDtypeStruct((B, T, C), x.dtype),
        grid_spec=pltpu.PrefetchScalarGridSpec(
            num_scalar_prefetch=0,
            grid=(B,),
            in_specs=in_specs,
            out_specs=pl.BlockSpec((1, T, C), lambda b: (b, 0, 0)),
        ),
        compiler_params=pltpu.CompilerParams(
            # batch steps are independent -> shard across TCs on v7x megacore
            dimension_semantics=("parallel",),
        ),
        cost_estimate=pl.CostEstimate(
            flops=flops,
            transcendentals=transcendentals,
            bytes_accessed=bytes_accessed,
        ),
    )(x, enc_out, *param_list)


# -------------------------- deterministic parameters --------------------------
def init_params(key):
    ks = jax.random.split(key, 16)

    def lin(k, din, dout):
        w = jax.random.normal(k, (din, dout), jnp.float32) * 0.02
        b = jnp.zeros((1, dout), jnp.float32)
        return w, b

    ln1_g = jnp.ones((1, EMBED), jnp.float32); ln1_b = jnp.zeros((1, EMBED), jnp.float32)
    ln2_g = jnp.ones((1, EMBED), jnp.float32); ln2_b = jnp.zeros((1, EMBED), jnp.float32)
    ln3_g = jnp.ones((1, EMBED), jnp.float32); ln3_b = jnp.zeros((1, EMBED), jnp.float32)

    attn_w, attn_b = lin(ks[0], EMBED, 3 * EMBED)
    aproj_w, aproj_b = lin(ks[1], EMBED, EMBED)
    cq_w, cq_b = lin(ks[2], EMBED, EMBED)
    ck_w, ck_b = lin(ks[3], EMBED, EMBED)
    cv_w, cv_b = lin(ks[4], EMBED, EMBED)
    cproj_w, cproj_b = lin(ks[5], EMBED, EMBED)
    fc_w, fc_b = lin(ks[6], EMBED, EMBED * MLP_RATIO)
    mproj_w, mproj_b = lin(ks[7], EMBED * MLP_RATIO, EMBED)

    return (
        ln1_g, ln1_b,
        attn_w, attn_b, aproj_w, aproj_b,
        ln2_g, ln2_b,
        cq_w, cq_b, ck_w, ck_b, cv_w, cv_b, cproj_w, cproj_b,
        ln3_g, ln3_b,
        fc_w, fc_b, mproj_w, mproj_b,
    )


# ----------------------------- pure-JAX reference ------------------------------
def reference(x, enc, params):
    (ln1_g, ln1_b, attn_w, attn_b, aproj_w, aproj_b,
     ln2_g, ln2_b, cq_w, cq_b, ck_w, ck_b, cv_w, cv_b, cproj_w, cproj_b,
     ln3_g, ln3_b, fc_w, fc_b, mproj_w, mproj_b) = params

    def ln(x, g, b):
        mu = jnp.mean(x, -1, keepdims=True)
        var = jnp.mean((x - mu) ** 2, -1, keepdims=True)
        return (x - mu) / jnp.sqrt(var + LN_EPS) * g + b

    def heads(a):  # (B,T,C) -> (B,H,T,Hd)
        B, T, _ = a.shape
        return a.reshape(B, T, N_HEADS, HEAD).transpose(0, 2, 1, 3)

    def mha(q, k, v, causal):
        s = jnp.einsum('bhqd,bhkd->bhqk', q, k) * (HEAD ** -0.5)
        if causal:
            T, Tk = s.shape[-2], s.shape[-1]
            mask = jnp.tril(jnp.ones((T, Tk), bool))
            s = jnp.where(mask, s, -jnp.inf)
        p = jax.nn.softmax(s, axis=-1)
        o = jnp.einsum('bhqk,bhkd->bhqd', p, v)
        B, H, T, D = o.shape
        return o.transpose(0, 2, 1, 3).reshape(B, T, H * D)

    # self attn
    h1 = ln(x, ln1_g, ln1_b)
    qkv = h1 @ attn_w + attn_b
    q, k, v = jnp.split(qkv, 3, axis=-1)
    x = x + (mha(heads(q), heads(k), heads(v), True) @ aproj_w + aproj_b)
    # cross attn
    h2 = ln(x, ln2_g, ln2_b)
    qc, kc, vc = h2 @ cq_w + cq_b, enc @ ck_w + ck_b, enc @ cv_w + cv_b
    x = x + (mha(heads(qc), heads(kc), heads(vc), False) @ cproj_w + cproj_b)
    # mlp
    h3 = ln(x, ln3_g, ln3_b)
    m = h3 @ fc_w + fc_b
    m = 0.5 * m * (1.0 + jax.lax.erf(m / jnp.sqrt(2.0)))
    x = x + (m @ mproj_w + mproj_b)
    return x


if __name__ == "__main__":
    key = jax.random.PRNGKey(0)
    kx, kenc, kp = jax.random.split(key, 3)

    x = jax.random.normal(kx, (BATCH, SEQ, EMBED), jnp.float32)
    enc_out = jax.random.normal(kenc, (BATCH, ENC_SEQ, EMBED), jnp.float32)
    params = init_params(kp)

    out = gpt2_block(x, enc_out, params)
    out = jax.block_until_ready(out)

    ref = reference(x, enc_out, params)
    # tolerance accounts for the EUP approximate reciprocal in the softmax
    np.testing.assert_allclose(np.asarray(out), np.asarray(ref), rtol=2e-3, atol=2e-3)

    print("KERNEL_OK")
</pallas_src>

<mosaic_0001>
module attributes {stable_mosaic.version = 11 : i64} {
  func.func @gpt2_block_kernel(%arg0: i32, %arg1: memref<1x8x32xf32, #tpu.memory_space<vmem>>, %arg2: memref<1x8x32xf32, #tpu.memory_space<vmem>>, %arg3: memref<1x32xf32, #tpu.memory_space<vmem>>, %arg4: memref<1x32xf32, #tpu.memory_space<vmem>>, %arg5: memref<4x32x8xf32, #tpu.memory_space<vmem>>, %arg6: memref<4x1x8xf32, #tpu.memory_space<vmem>>, %arg7: memref<4x32x8xf32, #tpu.memory_space<vmem>>, %arg8: memref<4x1x8xf32, #tpu.memory_space<vmem>>, %arg9: memref<4x32x8xf32, #tpu.memory_space<vmem>>, %arg10: memref<4x1x8xf32, #tpu.memory_space<vmem>>, %arg11: memref<4x8x32xf32, #tpu.memory_space<vmem>>, %arg12: memref<1x32xf32, #tpu.memory_space<vmem>>, %arg13: memref<1x32xf32, #tpu.memory_space<vmem>>, %arg14: memref<1x32xf32, #tpu.memory_space<vmem>>, %arg15: memref<4x32x8xf32, #tpu.memory_space<vmem>>, %arg16: memref<4x1x8xf32, #tpu.memory_space<vmem>>, %arg17: memref<4x32x8xf32, #tpu.memory_space<vmem>>, %arg18: memref<4x1x8xf32, #tpu.memory_space<vmem>>, %arg19: memref<4x32x8xf32, #tpu.memory_space<vmem>>, %arg20: memref<4x1x8xf32, #tpu.memory_space<vmem>>, %arg21: memref<4x8x32xf32, #tpu.memory_space<vmem>>, %arg22: memref<1x32xf32, #tpu.memory_space<vmem>>, %arg23: memref<1x32xf32, #tpu.memory_space<vmem>>, %arg24: memref<1x32xf32, #tpu.memory_space<vmem>>, %arg25: memref<32x128xf32, #tpu.memory_space<vmem>>, %arg26: memref<1x128xf32, #tpu.memory_space<vmem>>, %arg27: memref<128x32xf32, #tpu.memory_space<vmem>>, %arg28: memref<1x32xf32, #tpu.memory_space<vmem>>, %arg29: memref<1x8x32xf32, #tpu.memory_space<vmem>>) attributes {dimension_semantics = [#tpu.dimension_semantics<parallel>], iteration_bounds = array<i64: 2>, scalar_prefetch = 0 : i64, scratch_operands = 0 : i64, tpu.core_type = #tpu.core_type<tc>, window_params = [{transform_indices = @transform_0, window_bounds = array<i64: 1, 8, 32>}, {transform_indices = @transform_1, window_bounds = array<i64: 1, 8, 32>}, {pipeline_mode = #tpu.pipeline_mode<synchronous>, transform_indices = @transform_2, window_bounds = array<i64: 1, 32>}, {pipeline_mode = #tpu.pipeline_mode<synchronous>, transform_indices = @transform_3, window_bounds = array<i64: 1, 32>}, {pipeline_mode = #tpu.pipeline_mode<synchronous>, transform_indices = @transform_4, window_bounds = array<i64: 4, 32, 8>}, {pipeline_mode = #tpu.pipeline_mode<synchronous>, transform_indices = @transform_5, window_bounds = array<i64: 4, 1, 8>}, {pipeline_mode = #tpu.pipeline_mode<synchronous>, transform_indices = @transform_6, window_bounds = array<i64: 4, 32, 8>}, {pipeline_mode = #tpu.pipeline_mode<synchronous>, transform_indices = @transform_7, window_bounds = array<i64: 4, 1, 8>}, {pipeline_mode = #tpu.pipeline_mode<synchronous>, transform_indices = @transform_8, window_bounds = array<i64: 4, 32, 8>}, {pipeline_mode = #tpu.pipeline_mode<synchronous>, transform_indices = @transform_9, window_bounds = array<i64: 4, 1, 8>}, {pipeline_mode = #tpu.pipeline_mode<synchronous>, transform_indices = @transform_10, window_bounds = array<i64: 4, 8, 32>}, {pipeline_mode = #tpu.pipeline_mode<synchronous>, transform_indices = @transform_11, window_bounds = array<i64: 1, 32>}, {pipeline_mode = #tpu.pipeline_mode<synchronous>, transform_indices = @transform_12, window_bounds = array<i64: 1, 32>}, {pipeline_mode = #tpu.pipeline_mode<synchronous>, transform_indices = @transform_13, window_bounds = array<i64: 1, 32>}, {pipeline_mode = #tpu.pipeline_mode<synchronous>, transform_indices = @transform_14, window_bounds = array<i64: 4, 32, 8>}, {pipeline_mode = #tpu.pipeline_mode<synchronous>, transform_indices = @transform_15, window_bounds = array<i64: 4, 1, 8>}, {pipeline_mode = #tpu.pipeline_mode<synchronous>, transform_indices = @transform_16, window_bounds = array<i64: 4, 32, 8>}, {pipeline_mode = #tpu.pipeline_mode<synchronous>, transform_indices = @transform_17, window_bounds = array<i64: 4, 1, 8>}, {pipeline_mode = #tpu.pipeline_mode<synchronous>, transform_indices = @transform_18, window_bounds = array<i64: 4, 32, 8>}, {pipeline_mode = #tpu.pipeline_mode<synchronous>, transform_indices = @transform_19, window_bounds = array<i64: 4, 1, 8>}, {pipeline_mode = #tpu.pipeline_mode<synchronous>, transform_indices = @transform_20, window_bounds = array<i64: 4, 8, 32>}, {pipeline_mode = #tpu.pipeline_mode<synchronous>, transform_indices = @transform_21, window_bounds = array<i64: 1, 32>}, {pipeline_mode = #tpu.pipeline_mode<synchronous>, transform_indices = @transform_22, window_bounds = array<i64: 1, 32>}, {pipeline_mode = #tpu.pipeline_mode<synchronous>, transform_indices = @transform_23, window_bounds = array<i64: 1, 32>}, {pipeline_mode = #tpu.pipeline_mode<synchronous>, transform_indices = @transform_24, window_bounds = array<i64: 32, 128>}, {pipeline_mode = #tpu.pipeline_mode<synchronous>, transform_indices = @transform_25, window_bounds = array<i64: 1, 128>}, {pipeline_mode = #tpu.pipeline_mode<synchronous>, transform_indices = @transform_26, window_bounds = array<i64: 128, 32>}, {pipeline_mode = #tpu.pipeline_mode<synchronous>, transform_indices = @transform_27, window_bounds = array<i64: 1, 32>}, {transform_indices = @transform_28, window_bounds = array<i64: 1, 8, 32>}]} {
    %c0 = arith.constant 0 : index
    %c0_0 = arith.constant 0 : index
    %c0_1 = arith.constant 0 : index
    %0 = vector.load %arg1[%c0, %c0_0, %c0_1] : memref<1x8x32xf32, #tpu.memory_space<vmem>>, vector<1x8x32xf32>
    %1 = vector.shape_cast %0 : vector<1x8x32xf32> to vector<8x32xf32>
    %c0_2 = arith.constant 0 : index
    %c0_3 = arith.constant 0 : index
    %c0_4 = arith.constant 0 : index
    %2 = vector.load %arg2[%c0_2, %c0_3, %c0_4] : memref<1x8x32xf32, #tpu.memory_space<vmem>>, vector<1x8x32xf32>
    %3 = vector.shape_cast %2 : vector<1x8x32xf32> to vector<8x32xf32>
    %c0_5 = arith.constant 0 : index
    %c0_6 = arith.constant 0 : index
    %4 = vector.load %arg3[%c0_5, %c0_6] : memref<1x32xf32, #tpu.memory_space<vmem>>, vector<1x32xf32>
    %c0_7 = arith.constant 0 : index
    %c0_8 = arith.constant 0 : index
    %5 = vector.load %arg4[%c0_7, %c0_8] : memref<1x32xf32, #tpu.memory_space<vmem>>, vector<1x32xf32>
    %cst = arith.constant dense<0.000000e+00> : vector<8xf32>
    %6 = vector.multi_reduction <add>, %1, %cst [1] : vector<8x32xf32> to vector<8xf32>
    %7 = vector.shape_cast %6 : vector<8xf32> to vector<8x1xf32>
    %cst_9 = arith.constant 3.200000e+01 : f32
    %8 = vector.broadcast %cst_9 : f32 to vector<8x1xf32>
    %9 = arith.divf %7, %8 : vector<8x1xf32>
    %10 = vector.broadcast %9 : vector<8x1xf32> to vector<8x32xf32>
    %11 = arith.subf %1, %10 : vector<8x32xf32>
    %12 = arith.mulf %11, %11 : vector<8x32xf32>
    %cst_10 = arith.constant dense<0.000000e+00> : vector<8xf32>
    %13 = vector.multi_reduction <add>, %12, %cst_10 [1] : vector<8x32xf32> to vector<8xf32>
    %14 = vector.shape_cast %13 : vector<8xf32> to vector<8x1xf32>
    %cst_11 = arith.constant 3.200000e+01 : f32
    %15 = vector.broadcast %cst_11 : f32 to vector<8x1xf32>
    %16 = arith.divf %14, %15 : vector<8x1xf32>
    %17 = vector.broadcast %9 : vector<8x1xf32> to vector<8x32xf32>
    %18 = arith.subf %1, %17 : vector<8x32xf32>
    %cst_12 = arith.constant 9.99999974E-6 : f32
    %19 = vector.broadcast %cst_12 : f32 to vector<8x1xf32>
    %20 = arith.addf %16, %19 : vector<8x1xf32>
    %21 = math.rsqrt %20 : vector<8x1xf32>
    %22 = vector.broadcast %21 : vector<8x1xf32> to vector<8x32xf32>
    %23 = arith.mulf %18, %22 : vector<8x32xf32>
    %24 = vector.broadcast %4 : vector<1x32xf32> to vector<8x32xf32>
    %25 = arith.mulf %23, %24 : vector<8x32xf32>
    %26 = vector.broadcast %5 : vector<1x32xf32> to vector<8x32xf32>
    %27 = arith.addf %25, %26 : vector<8x32xf32>
    %28 = tpu.iota {dimensions = array<i32: 0>} : vector<8x8xi32>
    %29 = tpu.iota {dimensions = array<i32: 1>} : vector<8x8xi32>
    %30 = arith.cmpi sge, %28, %29 : vector<8x8xi32>
    %c0_13 = arith.constant 0 : index
    %c0_14 = arith.constant 0 : index
    %c0_15 = arith.constant 0 : index
    %31 = vector.load %arg5[%c0_13, %c0_14, %c0_15] : memref<4x32x8xf32, #tpu.memory_space<vmem>>, vector<1x32x8xf32>
    %32 = vector.shape_cast %31 : vector<1x32x8xf32> to vector<32x8xf32>
    %cst_16 = arith.constant dense<0.000000e+00> : vector<8x8xf32>
    %33 = tpu.matmul %27, %32, %cst_16 {dimension_numbers = #tpu.dot_dimension_numbers<[1], [0], [0], [1], [0, 0, 1, 1], [], []>} : vector<8x32xf32>, vector<32x8xf32>, vector<8x8xf32> -> vector<8x8xf32>
    %c0_17 = arith.constant 0 : index
    %c0_18 = arith.constant 0 : index
    %c0_19 = arith.constant 0 : index
    %34 = vector.load %arg6[%c0_17, %c0_18, %c0_19] : memref<4x1x8xf32, #tpu.memory_space<vmem>>, vector<1x1x8xf32>
    %35 = vector.shape_cast %34 : vector<1x1x8xf32> to vector<1x8xf32>
    %36 = vector.broadcast %35 : vector<1x8xf32> to vector<8x8xf32>
    %37 = arith.addf %33, %36 : vector<8x8xf32>
    %cst_20 = arith.constant 0.353553385 : f32
    %38 = vector.broadcast %cst_20 : f32 to vector<8x8xf32>
    %39 = arith.mulf %37, %38 : vector<8x8xf32>
    %c0_21 = arith.constant 0 : index
    %c0_22 = arith.constant 0 : index
    %c0_23 = arith.constant 0 : index
    %40 = vector.load %arg7[%c0_21, %c0_22, %c0_23] : memref<4x32x8xf32, #tpu.memory_space<vmem>>, vector<1x32x8xf32>
    %41 = vector.shape_cast %40 : vector<1x32x8xf32> to vector<32x8xf32>
    %cst_24 = arith.constant dense<0.000000e+00> : vector<8x8xf32>
    %42 = tpu.matmul %27, %41, %cst_24 {dimension_numbers = #tpu.dot_dimension_numbers<[1], [0], [0], [1], [0, 0, 1, 1], [], []>} : vector<8x32xf32>, vector<32x8xf32>, vector<8x8xf32> -> vector<8x8xf32>
    %c0_25 = arith.constant 0 : index
    %c0_26 = arith.constant 0 : index
    %c0_27 = arith.constant 0 : index
    %43 = vector.load %arg8[%c0_25, %c0_26, %c0_27] : memref<4x1x8xf32, #tpu.memory_space<vmem>>, vector<1x1x8xf32>
    %44 = vector.shape_cast %43 : vector<1x1x8xf32> to vector<1x8xf32>
    %45 = vector.broadcast %44 : vector<1x8xf32> to vector<8x8xf32>
    %46 = arith.addf %42, %45 : vector<8x8xf32>
    %c0_28 = arith.constant 0 : index
    %c0_29 = arith.constant 0 : index
    %c0_30 = arith.constant 0 : index
    %47 = vector.load %arg9[%c0_28, %c0_29, %c0_30] : memref<4x32x8xf32, #tpu.memory_space<vmem>>, vector<1x32x8xf32>
    %48 = vector.shape_cast %47 : vector<1x32x8xf32> to vector<32x8xf32>
    %cst_31 = arith.constant dense<0.000000e+00> : vector<8x8xf32>
    %49 = tpu.matmul %27, %48, %cst_31 {dimension_numbers = #tpu.dot_dimension_numbers<[1], [0], [0], [1], [0, 0, 1, 1], [], []>} : vector<8x32xf32>, vector<32x8xf32>, vector<8x8xf32> -> vector<8x8xf32>
    %c0_32 = arith.constant 0 : index
    %c0_33 = arith.constant 0 : index
    %c0_34 = arith.constant 0 : index
    %50 = vector.load %arg10[%c0_32, %c0_33, %c0_34] : memref<4x1x8xf32, #tpu.memory_space<vmem>>, vector<1x1x8xf32>
    %51 = vector.shape_cast %50 : vector<1x1x8xf32> to vector<1x8xf32>
    %52 = vector.broadcast %51 : vector<1x8xf32> to vector<8x8xf32>
    %53 = arith.addf %49, %52 : vector<8x8xf32>
    %54 = tpu.transpose %46, [1, 0] : vector<8x8xf32> -> vector<8x8xf32>
    %cst_35 = arith.constant dense<0.000000e+00> : vector<8x8xf32>
    %55 = tpu.matmul %39, %54, %cst_35 {dimension_numbers = #tpu.dot_dimension_numbers<[1], [0], [0], [1], [0, 0, 1, 1], [], []>} : vector<8x8xf32>, vector<8x8xf32>, vector<8x8xf32> -> vector<8x8xf32>
    %cst_36 = arith.constant 0xFF800000 : f32
    %56 = vector.broadcast %cst_36 : f32 to vector<8x8xf32>
    %57 = arith.select %30, %55, %56 : vector<8x8xi1>, vector<8x8xf32>
    %cst_37 = arith.constant dense<0xFF800000> : vector<8xf32>
    %58 = vector.multi_reduction <maximumf>, %57, %cst_37 [1] : vector<8x8xf32> to vector<8xf32>
    %59 = vector.shape_cast %58 : vector<8xf32> to vector<8x1xf32>
    %60 = vector.broadcast %59 : vector<8x1xf32> to vector<8x8xf32>
    %61 = arith.subf %57, %60 : vector<8x8xf32>
    %62 = math.exp %61 : vector<8x8xf32>
    %cst_38 = arith.constant dense<0.000000e+00> : vector<8xf32>
    %63 = vector.multi_reduction <add>, %62, %cst_38 [1] : vector<8x8xf32> to vector<8xf32>
    %64 = vector.shape_cast %63 : vector<8xf32> to vector<8x1xf32>
    %65 = tpu.reciprocal %64 {approx = true} : vector<8x1xf32> -> vector<8x1xf32>
    %66 = vector.broadcast %65 : vector<8x1xf32> to vector<8x8xf32>
    %67 = arith.mulf %62, %66 : vector<8x8xf32>
    %cst_39 = arith.constant dense<0.000000e+00> : vector<8x8xf32>
    %68 = tpu.matmul %67, %53, %cst_39 {dimension_numbers = #tpu.dot_dimension_numbers<[1], [0], [0], [1], [0, 0, 1, 1], [], []>} : vector<8x8xf32>, vector<8x8xf32>, vector<8x8xf32> -> vector<8x8xf32>
    %c0_40 = arith.constant 0 : index
    %c0_41 = arith.constant 0 : index
    %c0_42 = arith.constant 0 : index
    %69 = vector.load %arg11[%c0_40, %c0_41, %c0_42] : memref<4x8x32xf32, #tpu.memory_space<vmem>>, vector<1x8x32xf32>
    %70 = vector.shape_cast %69 : vector<1x8x32xf32> to vector<8x32xf32>
    %cst_43 = arith.constant dense<0.000000e+00> : vector<8x32xf32>
    %71 = tpu.matmul %68, %70, %cst_43 {dimension_numbers = #tpu.dot_dimension_numbers<[1], [0], [0], [1], [0, 0, 1, 1], [], []>} : vector<8x8xf32>, vector<8x32xf32>, vector<8x32xf32> -> vector<8x32xf32>
    %c1 = arith.constant 1 : index
    %c0_44 = arith.constant 0 : index
    %c0_45 = arith.constant 0 : index
    %72 = vector.load %arg5[%c1, %c0_44, %c0_45] : memref<4x32x8xf32, #tpu.memory_space<vmem>>, vector<1x32x8xf32>
    %73 = vector.shape_cast %72 : vector<1x32x8xf32> to vector<32x8xf32>
    %cst_46 = arith.constant dense<0.000000e+00> : vector<8x8xf32>
    %74 = tpu.matmul %27, %73, %cst_46 {dimension_numbers = #tpu.dot_dimension_numbers<[1], [0], [0], [1], [0, 0, 1, 1], [], []>} : vector<8x32xf32>, vector<32x8xf32>, vector<8x8xf32> -> vector<8x8xf32>
    %c1_47 = arith.constant 1 : index
    %c0_48 = arith.constant 0 : index
    %c0_49 = arith.constant 0 : index
    %75 = vector.load %arg6[%c1_47, %c0_48, %c0_49] : memref<4x1x8xf32, #tpu.memory_space<vmem>>, vector<1x1x8xf32>
    %76 = vector.shape_cast %75 : vector<1x1x8xf32> to vector<1x8xf32>
    %77 = vector.broadcast %76 : vector<1x8xf32> to vector<8x8xf32>
    %78 = arith.addf %74, %77 : vector<8x8xf32>
    %cst_50 = arith.constant 0.353553385 : f32
    %79 = vector.broadcast %cst_50 : f32 to vector<8x8xf32>
    %80 = arith.mulf %78, %79 : vector<8x8xf32>
    %c1_51 = arith.constant 1 : index
    %c0_52 = arith.constant 0 : index
    %c0_53 = arith.constant 0 : index
    %81 = vector.load %arg7[%c1_51, %c0_52, %c0_53] : memref<4x32x8xf32, #tpu.memory_space<vmem>>, vector<1x32x8xf32>
    %82 = vector.shape_cast %81 : vector<1x32x8xf32> to vector<32x8xf32>
    %cst_54 = arith.constant dense<0.000000e+00> : vector<8x8xf32>
    %83 = tpu.matmul %27, %82, %cst_54 {dimension_numbers = #tpu.dot_dimension_numbers<[1], [0], [0], [1], [0, 0, 1, 1], [], []>} : vector<8x32xf32>, vector<32x8xf32>, vector<8x8xf32> -> vector<8x8xf32>
    %c1_55 = arith.constant 1 : index
    %c0_56 = arith.constant 0 : index
    %c0_57 = arith.constant 0 : index
    %84 = vector.load %arg8[%c1_55, %c0_56, %c0_57] : memref<4x1x8xf32, #tpu.memory_space<vmem>>, vector<1x1x8xf32>
    %85 = vector.shape_cast %84 : vector<1x1x8xf32> to vector<1x8xf32>
    %86 = vector.broadcast %85 : vector<1x8xf32> to vector<8x8xf32>
    %87 = arith.addf %83, %86 : vector<8x8xf32>
    %c1_58 = arith.constant 1 : index
    %c0_59 = arith.constant 0 : index
    %c0_60 = arith.constant 0 : index
    %88 = vector.load %arg9[%c1_58, %c0_59, %c0_60] : memref<4x32x8xf32, #tpu.memory_space<vmem>>, vector<1x32x8xf32>
    %89 = vector.shape_cast %88 : vector<1x32x8xf32> to vector<32x8xf32>
    %cst_61 = arith.constant dense<0.000000e+00> : vector<8x8xf32>
    %90 = tpu.matmul %27, %89, %cst_61 {dimension_numbers = #tpu.dot_dimension_numbers<[1], [0], [0], [1], [0, 0, 1, 1], [], []>} : vector<8x32xf32>, vector<32x8xf32>, vector<8x8xf32> -> vector<8x8xf32>
    %c1_62 = arith.constant 1 : index
    %c0_63 = arith.constant 0 : index
    %c0_64 = arith.constant 0 : index
    %91 = vector.load %arg10[%c1_62, %c0_63, %c0_64] : memref<4x1x8xf32, #tpu.memory_space<vmem>>, vector<1x1x8xf32>
    %92 = vector.shape_cast %91 : vector<1x1x8xf32> to vector<1x8xf32>
    %93 = vector.broadcast %92 : vector<1x8xf32> to vector<8x8xf32>
    %94 = arith.addf %90, %93 : vector<8x8xf32>
    %95 = tpu.transpose %87, [1, 0] : vector<8x8xf32> -> vector<8x8xf32>
    %cst_65 = arith.constant dense<0.000000e+00> : vector<8x8xf32>
    %96 = tpu.matmul %80, %95, %cst_65 {dimension_numbers = #tpu.dot_dimension_numbers<[1], [0], [0], [1], [0, 0, 1, 1], [], []>} : vector<8x8xf32>, vector<8x8xf32>, vector<8x8xf32> -> vector<8x8xf32>
    %cst_66 = arith.constant 0xFF800000 : f32
    %97 = vector.broadcast %cst_66 : f32 to vector<8x8xf32>
    %98 = arith.select %30, %96, %97 : vector<8x8xi1>, vector<8x8xf32>
    %cst_67 = arith.constant dense<0xFF800000> : vector<8xf32>
    %99 = vector.multi_reduction <maximumf>, %98, %cst_67 [1] : vector<8x8xf32> to vector<8xf32>
    %100 = vector.shape_cast %99 : vector<8xf32> to vector<8x1xf32>
    %101 = vector.broadcast %100 : vector<8x1xf32> to vector<8x8xf32>
    %102 = arith.subf %98, %101 : vector<8x8xf32>
    %103 = math.exp %102 : vector<8x8xf32>
    %cst_68 = arith.constant dense<0.000000e+00> : vector<8xf32>
    %104 = vector.multi_reduction <add>, %103, %cst_68 [1] : vector<8x8xf32> to vector<8xf32>
    %105 = vector.shape_cast %104 : vector<8xf32> to vector<8x1xf32>
    %106 = tpu.reciprocal %105 {approx = true} : vector<8x1xf32> -> vector<8x1xf32>
    %107 = vector.broadcast %106 : vector<8x1xf32> to vector<8x8xf32>
    %108 = arith.mulf %103, %107 : vector<8x8xf32>
    %cst_69 = arith.constant dense<0.000000e+00> : vector<8x8xf32>
    %109 = tpu.matmul %108, %94, %cst_69 {dimension_numbers = #tpu.dot_dimension_numbers<[1], [0], [0], [1], [0, 0, 1, 1], [], []>} : vector<8x8xf32>, vector<8x8xf32>, vector<8x8xf32> -> vector<8x8xf32>
    %c1_70 = arith.constant 1 : index
    %c0_71 = arith.constant 0 : index
    %c0_72 = arith.constant 0 : index
    %110 = vector.load %arg11[%c1_70, %c0_71, %c0_72] : memref<4x8x32xf32, #tpu.memory_space<vmem>>, vector<1x8x32xf32>
    %111 = vector.shape_cast %110 : vector<1x8x32xf32> to vector<8x32xf32>
    %cst_73 = arith.constant dense<0.000000e+00> : vector<8x32xf32>
    %112 = tpu.matmul %109, %111, %cst_73 {dimension_numbers = #tpu.dot_dimension_numbers<[1], [0], [0], [1], [0, 0, 1, 1], [], []>} : vector<8x8xf32>, vector<8x32xf32>, vector<8x32xf32> -> vector<8x32xf32>
    %113 = arith.addf %71, %112 : vector<8x32xf32>
    %c2 = arith.constant 2 : index
    %c0_74 = arith.constant 0 : index
    %c0_75 = arith.constant 0 : index
    %114 = vector.load %arg5[%c2, %c0_74, %c0_75] : memref<4x32x8xf32, #tpu.memory_space<vmem>>, vector<1x32x8xf32>
    %115 = vector.shape_cast %114 : vector<1x32x8xf32> to vector<32x8xf32>
    %cst_76 = arith.constant dense<0.000000e+00> : vector<8x8xf32>
    %116 = tpu.matmul %27, %115, %cst_76 {dimension_numbers = #tpu.dot_dimension_numbers<[1], [0], [0], [1], [0, 0, 1, 1], [], []>} : vector<8x32xf32>, vector<32x8xf32>, vector<8x8xf32> -> vector<8x8xf32>
    %c2_77 = arith.constant 2 : index
    %c0_78 = arith.constant 0 : index
    %c0_79 = arith.constant 0 : index
    %117 = vector.load %arg6[%c2_77, %c0_78, %c0_79] : memref<4x1x8xf32, #tpu.memory_space<vmem>>, vector<1x1x8xf32>
    %118 = vector.shape_cast %117 : vector<1x1x8xf32> to vector<1x8xf32>
    %119 = vector.broadcast %118 : vector<1x8xf32> to vector<8x8xf32>
    %120 = arith.addf %116, %119 : vector<8x8xf32>
    %cst_80 = arith.constant 0.353553385 : f32
    %121 = vector.broadcast %cst_80 : f32 to vector<8x8xf32>
    %122 = arith.mulf %120, %121 : vector<8x8xf32>
    %c2_81 = arith.constant 2 : index
    %c0_82 = arith.constant 0 : index
    %c0_83 = arith.constant 0 : index
    %123 = vector.load %arg7[%c2_81, %c0_82, %c0_83] : memref<4x32x8xf32, #tpu.memory_space<vmem>>, vector<1x32x8xf32>
    %124 = vector.shape_cast %123 : vector<1x32x8xf32> to vector<32x8xf32>
    %cst_84 = arith.constant dense<0.000000e+00> : vector<8x8xf32>
    %125 = tpu.matmul %27, %124, %cst_84 {dimension_numbers = #tpu.dot_dimension_numbers<[1], [0], [0], [1], [0, 0, 1, 1], [], []>} : vector<8x32xf32>, vector<32x8xf32>, vector<8x8xf32> -> vector<8x8xf32>
    %c2_85 = arith.constant 2 : index
    %c0_86 = arith.constant 0 : index
    %c0_87 = arith.constant 0 : index
    %126 = vector.load %arg8[%c2_85, %c0_86, %c0_87] : memref<4x1x8xf32, #tpu.memory_space<vmem>>, vector<1x1x8xf32>
    %127 = vector.shape_cast %126 : vector<1x1x8xf32> to vector<1x8xf32>
    %128 = vector.broadcast %127 : vector<1x8xf32> to vector<8x8xf32>
    %129 = arith.addf %125, %128 : vector<8x8xf32>
    %c2_88 = arith.constant 2 : index
    %c0_89 = arith.constant 0 : index
    %c0_90 = arith.constant 0 : index
    %130 = vector.load %arg9[%c2_88, %c0_89, %c0_90] : memref<4x32x8xf32, #tpu.memory_space<vmem>>, vector<1x32x8xf32>
    %131 = vector.shape_cast %130 : vector<1x32x8xf32> to vector<32x8xf32>
    %cst_91 = arith.constant dense<0.000000e+00> : vector<8x8xf32>
    %132 = tpu.matmul %27, %131, %cst_91 {dimension_numbers = #tpu.dot_dimension_numbers<[1], [0], [0], [1], [0, 0, 1, 1], [], []>} : vector<8x32xf32>, vector<32x8xf32>, vector<8x8xf32> -> vector<8x8xf32>
    %c2_92 = arith.constant 2 : index
    %c0_93 = arith.constant 0 : index
    %c0_94 = arith.constant 0 : index
    %133 = vector.load %arg10[%c2_92, %c0_93, %c0_94] : memref<4x1x8xf32, #tpu.memory_space<vmem>>, vector<1x1x8xf32>
    %134 = vector.shape_cast %133 : vector<1x1x8xf32> to vector<1x8xf32>
    %135 = vector.broadcast %134 : vector<1x8xf32> to vector<8x8xf32>
    %136 = arith.addf %132, %135 : vector<8x8xf32>
    %137 = tpu.transpose %129, [1, 0] : vector<8x8xf32> -> vector<8x8xf32>
    %cst_95 = arith.constant dense<0.000000e+00> : vector<8x8xf32>
    %138 = tpu.matmul %122, %137, %cst_95 {dimension_numbers = #tpu.dot_dimension_numbers<[1], [0], [0], [1], [0, 0, 1, 1], [], []>} : vector<8x8xf32>, vector<8x8xf32>, vector<8x8xf32> -> vector<8x8xf32>
    %cst_96 = arith.constant 0xFF800000 : f32
    %139 = vector.broadcast %cst_96 : f32 to vector<8x8xf32>
    %140 = arith.select %30, %138, %139 : vector<8x8xi1>, vector<8x8xf32>
    %cst_97 = arith.constant dense<0xFF800000> : vector<8xf32>
    %141 = vector.multi_reduction <maximumf>, %140, %cst_97 [1] : vector<8x8xf32> to vector<8xf32>
    %142 = vector.shape_cast %141 : vector<8xf32> to vector<8x1xf32>
    %143 = vector.broadcast %142 : vector<8x1xf32> to vector<8x8xf32>
    %144 = arith.subf %140, %143 : vector<8x8xf32>
    %145 = math.exp %144 : vector<8x8xf32>
    %cst_98 = arith.constant dense<0.000000e+00> : vector<8xf32>
    %146 = vector.multi_reduction <add>, %145, %cst_98 [1] : vector<8x8xf32> to vector<8xf32>
    %147 = vector.shape_cast %146 : vector<8xf32> to vector<8x1xf32>
    %148 = tpu.reciprocal %147 {approx = true} : vector<8x1xf32> -> vector<8x1xf32>
    %149 = vector.broadcast %148 : vector<8x1xf32> to vector<8x8xf32>
    %150 = arith.mulf %145, %149 : vector<8x8xf32>
    %cst_99 = arith.constant dense<0.000000e+00> : vector<8x8xf32>
    %151 = tpu.matmul %150, %136, %cst_99 {dimension_numbers = #tpu.dot_dimension_numbers<[1], [0], [0], [1], [0, 0, 1, 1], [], []>} : vector<8x8xf32>, vector<8x8xf32>, vector<8x8xf32> -> vector<8x8xf32>
    %c2_100 = arith.constant 2 : index
    %c0_101 = arith.constant 0 : index
    %c0_102 = arith.constant 0 : index
    %152 = vector.load %arg11[%c2_100, %c0_101, %c0_102] : memref<4x8x32xf32, #tpu.memory_space<vmem>>, vector<1x8x32xf32>
    %153 = vector.shape_cast %152 : vector<1x8x32xf32> to vector<8x32xf32>
    %cst_103 = arith.constant dense<0.000000e+00> : vector<8x32xf32>
    %154 = tpu.matmul %151, %153, %cst_103 {dimension_numbers = #tpu.dot_dimension_numbers<[1], [0], [0], [1], [0, 0, 1, 1], [], []>} : vector<8x8xf32>, vector<8x32xf32>, vector<8x32xf32> -> vector<8x32xf32>
    %155 = arith.addf %113, %154 : vector<8x32xf32>
    %c3 = arith.constant 3 : index
    %c0_104 = arith.constant 0 : index
    %c0_105 = arith.constant 0 : index
    %156 = vector.load %arg5[%c3, %c0_104, %c0_105] : memref<4x32x8xf32, #tpu.memory_space<vmem>>, vector<1x32x8xf32>
    %157 = vector.shape_cast %156 : vector<1x32x8xf32> to vector<32x8xf32>
    %cst_106 = arith.constant dense<0.000000e+00> : vector<8x8xf32>
    %158 = tpu.matmul %27, %157, %cst_106 {dimension_numbers = #tpu.dot_dimension_numbers<[1], [0], [0], [1], [0, 0, 1, 1], [], []>} : vector<8x32xf32>, vector<32x8xf32>, vector<8x8xf32> -> vector<8x8xf32>
    %c3_107 = arith.constant 3 : index
    %c0_108 = arith.constant 0 : index
    %c0_109 = arith.constant 0 : index
    %159 = vector.load %arg6[%c3_107, %c0_108, %c0_109] : memref<4x1x8xf32, #tpu.memory_space<vmem>>, vector<1x1x8xf32>
    %160 = vector.shape_cast %159 : vector<1x1x8xf32> to vector<1x8xf32>
    %161 = vector.broadcast %160 : vector<1x8xf32> to vector<8x8xf32>
    %162 = arith.addf %158, %161 : vector<8x8xf32>
    %cst_110 = arith.constant 0.353553385 : f32
    %163 = vector.broadcast %cst_110 : f32 to vector<8x8xf32>
    %164 = arith.mulf %162, %163 : vector<8x8xf32>
    %c3_111 = arith.constant 3 : index
    %c0_112 = arith.constant 0 : index
    %c0_113 = arith.constant 0 : index
    %165 = vector.load %arg7[%c3_111, %c0_112, %c0_113] : memref<4x32x8xf32, #tpu.memory_space<vmem>>, vector<1x32x8xf32>
    %166 = vector.shape_cast %165 : vector<1x32x8xf32> to vector<32x8xf32>
    %cst_114 = arith.constant dense<0.000000e+00> : vector<8x8xf32>
    %167 = tpu.matmul %27, %166, %cst_114 {dimension_numbers = #tpu.dot_dimension_numbers<[1], [0], [0], [1], [0, 0, 1, 1], [], []>} : vector<8x32xf32>, vector<32x8xf32>, vector<8x8xf32> -> vector<8x8xf32>
    %c3_115 = arith.constant 3 : index
    %c0_116 = arith.constant 0 : index
    %c0_117 = arith.constant 0 : index
    %168 = vector.load %arg8[%c3_115, %c0_116, %c0_117] : memref<4x1x8xf32, #tpu.memory_space<vmem>>, vector<1x1x8xf32>
    %169 = vector.shape_cast %168 : vector<1x1x8xf32> to vector<1x8xf32>
    %170 = vector.broadcast %169 : vector<1x8xf32> to vector<8x8xf32>
    %171 = arith.addf %167, %170 : vector<8x8xf32>
    %c3_118 = arith.constant 3 : index
    %c0_119 = arith.constant 0 : index
    %c0_120 = arith.constant 0 : index
    %172 = vector.load %arg9[%c3_118, %c0_119, %c0_120] : memref<4x32x8xf32, #tpu.memory_space<vmem>>, vector<1x32x8xf32>
    %173 = vector.shape_cast %172 : vector<1x32x8xf32> to vector<32x8xf32>
    %cst_121 = arith.constant dense<0.000000e+00> : vector<8x8xf32>
    %174 = tpu.matmul %27, %173, %cst_121 {dimension_numbers = #tpu.dot_dimension_numbers<[1], [0], [0], [1], [0, 0, 1, 1], [], []>} : vector<8x32xf32>, vector<32x8xf32>, vector<8x8xf32> -> vector<8x8xf32>
    %c3_122 = arith.constant 3 : index
    %c0_123 = arith.constant 0 : index
    %c0_124 = arith.constant 0 : index
    %175 = vector.load %arg10[%c3_122, %c0_123, %c0_124] : memref<4x1x8xf32, #tpu.memory_space<vmem>>, vector<1x1x8xf32>
    %176 = vector.shape_cast %175 : vector<1x1x8xf32> to vector<1x8xf32>
    %177 = vector.broadcast %176 : vector<1x8xf32> to vector<8x8xf32>
    %178 = arith.addf %174, %177 : vector<8x8xf32>
    %179 = tpu.transpose %171, [1, 0] : vector<8x8xf32> -> vector<8x8xf32>
    %cst_125 = arith.constant dense<0.000000e+00> : vector<8x8xf32>
    %180 = tpu.matmul %164, %179, %cst_125 {dimension_numbers = #tpu.dot_dimension_numbers<[1], [0], [0], [1], [0, 0, 1, 1], [], []>} : vector<8x8xf32>, vector<8x8xf32>, vector<8x8xf32> -> vector<8x8xf32>
    %cst_126 = arith.constant 0xFF800000 : f32
    %181 = vector.broadcast %cst_126 : f32 to vector<8x8xf32>
    %182 = arith.select %30, %180, %181 : vector<8x8xi1>, vector<8x8xf32>
    %cst_127 = arith.constant dense<0xFF800000> : vector<8xf32>
    %183 = vector.multi_reduction <maximumf>, %182, %cst_127 [1] : vector<8x8xf32> to vector<8xf32>
    %184 = vector.shape_cast %183 : vector<8xf32> to vector<8x1xf32>
    %185 = vector.broadcast %184 : vector<8x1xf32> to vector<8x8xf32>
    %186 = arith.subf %182, %185 : vector<8x8xf32>
    %187 = math.exp %186 : vector<8x8xf32>
    %cst_128 = arith.constant dense<0.000000e+00> : vector<8xf32>
    %188 = vector.multi_reduction <add>, %187, %cst_128 [1] : vector<8x8xf32> to vector<8xf32>
    %189 = vector.shape_cast %188 : vector<8xf32> to vector<8x1xf32>
    %190 = tpu.reciprocal %189 {approx = true} : vector<8x1xf32> -> vector<8x1xf32>
    %191 = vector.broadcast %190 : vector<8x1xf32> to vector<8x8xf32>
    %192 = arith.mulf %187, %191 : vector<8x8xf32>
    %cst_129 = arith.constant dense<0.000000e+00> : vector<8x8xf32>
    %193 = tpu.matmul %192, %178, %cst_129 {dimension_numbers = #tpu.dot_dimension_numbers<[1], [0], [0], [1], [0, 0, 1, 1], [], []>} : vector<8x8xf32>, vector<8x8xf32>, vector<8x8xf32> -> vector<8x8xf32>
    %c3_130 = arith.constant 3 : index
    %c0_131 = arith.constant 0 : index
    %c0_132 = arith.constant 0 : index
    %194 = vector.load %arg11[%c3_130, %c0_131, %c0_132] : memref<4x8x32xf32, #tpu.memory_space<vmem>>, vector<1x8x32xf32>
    %195 = vector.shape_cast %194 : vector<1x8x32xf32> to vector<8x32xf32>
    %cst_133 = arith.constant dense<0.000000e+00> : vector<8x32xf32>
    %196 = tpu.matmul %193, %195, %cst_133 {dimension_numbers = #tpu.dot_dimension_numbers<[1], [0], [0], [1], [0, 0, 1, 1], [], []>} : vector<8x8xf32>, vector<8x32xf32>, vector<8x32xf32> -> vector<8x32xf32>
    %197 = arith.addf %155, %196 : vector<8x32xf32>
    %c0_134 = arith.constant 0 : index
    %c0_135 = arith.constant 0 : index
    %198 = vector.load %arg12[%c0_134, %c0_135] : memref<1x32xf32, #tpu.memory_space<vmem>>, vector<1x32xf32>
    %199 = vector.broadcast %198 : vector<1x32xf32> to vector<8x32xf32>
    %200 = arith.addf %197, %199 : vector<8x32xf32>
    %201 = arith.addf %1, %200 : vector<8x32xf32>
    %c0_136 = arith.constant 0 : index
    %c0_137 = arith.constant 0 : index
    %202 = vector.load %arg13[%c0_136, %c0_137] : memref<1x32xf32, #tpu.memory_space<vmem>>, vector<1x32xf32>
    %c0_138 = arith.constant 0 : index
    %c0_139 = arith.constant 0 : index
    %203 = vector.load %arg14[%c0_138, %c0_139] : memref<1x32xf32, #tpu.memory_space<vmem>>, vector<1x32xf32>
    %cst_140 = arith.constant dense<0.000000e+00> : vector<8xf32>
    %204 = vector.multi_reduction <add>, %201, %cst_140 [1] : vector<8x32xf32> to vector<8xf32>
    %205 = vector.shape_cast %204 : vector<8xf32> to vector<8x1xf32>
    %cst_141 = arith.constant 3.200000e+01 : f32
    %206 = vector.broadcast %cst_141 : f32 to vector<8x1xf32>
    %207 = arith.divf %205, %206 : vector<8x1xf32>
    %208 = vector.broadcast %207 : vector<8x1xf32> to vector<8x32xf32>
    %209 = arith.subf %201, %208 : vector<8x32xf32>
    %210 = arith.mulf %209, %209 : vector<8x32xf32>
    %cst_142 = arith.constant dense<0.000000e+00> : vector<8xf32>
    %211 = vector.multi_reduction <add>, %210, %cst_142 [1] : vector<8x32xf32> to vector<8xf32>
    %212 = vector.shape_cast %211 : vector<8xf32> to vector<8x1xf32>
    %cst_143 = arith.constant 3.200000e+01 : f32
    %213 = vector.broadcast %cst_143 : f32 to vector<8x1xf32>
    %214 = arith.divf %212, %213 : vector<8x1xf32>
    %215 = vector.broadcast %207 : vector<8x1xf32> to vector<8x32xf32>
    %216 = arith.subf %201, %215 : vector<8x32xf32>
    %cst_144 = arith.constant 9.99999974E-6 : f32
    %217 = vector.broadcast %cst_144 : f32 to vector<8x1xf32>
    %218 = arith.addf %214, %217 : vector<8x1xf32>
    %219 = math.rsqrt %218 : vector<8x1xf32>
    %220 = vector.broadcast %219 : vector<8x1xf32> to vector<8x32xf32>
    %221 = arith.mulf %216, %220 : vector<8x32xf32>
    %222 = vector.broadcast %202 : vector<1x32xf32> to vector<8x32xf32>
    %223 = arith.mulf %221, %222 : vector<8x32xf32>
    %224 = vector.broadcast %203 : vector<1x32xf32> to vector<8x32xf32>
    %225 = arith.addf %223, %224 : vector<8x32xf32>
    %c0_145 = arith.constant 0 : index
    %c0_146 = arith.constant 0 : index
    %c0_147 = arith.constant 0 : index
    %226 = vector.load %arg15[%c0_145, %c0_146, %c0_147] : memref<4x32x8xf32, #tpu.memory_space<vmem>>, vector<1x32x8xf32>
    %227 = vector.shape_cast %226 : vector<1x32x8xf32> to vector<32x8xf32>
    %cst_148 = arith.constant dense<0.000000e+00> : vector<8x8xf32>
    %228 = tpu.matmul %225, %227, %cst_148 {dimension_numbers = #tpu.dot_dimension_numbers<[1], [0], [0], [1], [0, 0, 1, 1], [], []>} : vector<8x32xf32>, vector<32x8xf32>, vector<8x8xf32> -> vector<8x8xf32>
    %c0_149 = arith.constant 0 : index
    %c0_150 = arith.constant 0 : index
    %c0_151 = arith.constant 0 : index
    %229 = vector.load %arg16[%c0_149, %c0_150, %c0_151] : memref<4x1x8xf32, #tpu.memory_space<vmem>>, vector<1x1x8xf32>
    %230 = vector.shape_cast %229 : vector<1x1x8xf32> to vector<1x8xf32>
    %231 = vector.broadcast %230 : vector<1x8xf32> to vector<8x8xf32>
    %232 = arith.addf %228, %231 : vector<8x8xf32>
    %cst_152 = arith.constant 0.353553385 : f32
    %233 = vector.broadcast %cst_152 : f32 to vector<8x8xf32>
    %234 = arith.mulf %232, %233 : vector<8x8xf32>
    %c0_153 = arith.constant 0 : index
    %c0_154 = arith.constant 0 : index
    %c0_155 = arith.constant 0 : index
    %235 = vector.load %arg17[%c0_153, %c0_154, %c0_155] : memref<4x32x8xf32, #tpu.memory_space<vmem>>, vector<1x32x8xf32>
    %236 = vector.shape_cast %235 : vector<1x32x8xf32> to vector<32x8xf32>
    %cst_156 = arith.constant dense<0.000000e+00> : vector<8x8xf32>
    %237 = tpu.matmul %3, %236, %cst_156 {dimension_numbers = #tpu.dot_dimension_numbers<[1], [0], [0], [1], [0, 0, 1, 1], [], []>} : vector<8x32xf32>, vector<32x8xf32>, vector<8x8xf32> -> vector<8x8xf32>
    %c0_157 = arith.constant 0 : index
    %c0_158 = arith.constant 0 : index
    %c0_159 = arith.constant 0 : index
    %238 = vector.load %arg18[%c0_157, %c0_158, %c0_159] : memref<4x1x8xf32, #tpu.memory_space<vmem>>, vector<1x1x8xf32>
    %239 = vector.shape_cast %238 : vector<1x1x8xf32> to vector<1x8xf32>
    %240 = vector.broadcast %239 : vector<1x8xf32> to vector<8x8xf32>
    %241 = arith.addf %237, %240 : vector<8x8xf32>
    %c0_160 = arith.constant 0 : index
    %c0_161 = arith.constant 0 : index
    %c0_162 = arith.constant 0 : index
    %242 = vector.load %arg19[%c0_160, %c0_161, %c0_162] : memref<4x32x8xf32, #tpu.memory_space<vmem>>, vector<1x32x8xf32>
    %243 = vector.shape_cast %242 : vector<1x32x8xf32> to vector<32x8xf32>
    %cst_163 = arith.constant dense<0.000000e+00> : vector<8x8xf32>
    %244 = tpu.matmul %3, %243, %cst_163 {dimension_numbers = #tpu.dot_dimension_numbers<[1], [0], [0], [1], [0, 0, 1, 1], [], []>} : vector<8x32xf32>, vector<32x8xf32>, vector<8x8xf32> -> vector<8x8xf32>
    %c0_164 = arith.constant 0 : index
    %c0_165 = arith.constant 0 : index
    %c0_166 = arith.constant 0 : index
    %245 = vector.load %arg20[%c0_164, %c0_165, %c0_166] : memref<4x1x8xf32, #tpu.memory_space<vmem>>, vector<1x1x8xf32>
    %246 = vector.shape_cast %245 : vector<1x1x8xf32> to vector<1x8xf32>
    %247 = vector.broadcast %246 : vector<1x8xf32> to vector<8x8xf32>
    %248 = arith.addf %244, %247 : vector<8x8xf32>
    %249 = tpu.transpose %241, [1, 0] : vector<8x8xf32> -> vector<8x8xf32>
    %cst_167 = arith.constant dense<0.000000e+00> : vector<8x8xf32>
    %250 = tpu.matmul %234, %249, %cst_167 {dimension_numbers = #tpu.dot_dimension_numbers<[1], [0], [0], [1], [0, 0, 1, 1], [], []>} : vector<8x8xf32>, vector<8x8xf32>, vector<8x8xf32> -> vector<8x8xf32>
    %cst_168 = arith.constant dense<0xFF800000> : vector<8xf32>
    %251 = vector.multi_reduction <maximumf>, %250, %cst_168 [1] : vector<8x8xf32> to vector<8xf32>
    %252 = vector.shape_cast %251 : vector<8xf32> to vector<8x1xf32>
    %253 = vector.broadcast %252 : vector<8x1xf32> to vector<8x8xf32>
    %254 = arith.subf %250, %253 : vector<8x8xf32>
    %255 = math.exp %254 : vector<8x8xf32>
    %cst_169 = arith.constant dense<0.000000e+00> : vector<8xf32>
    %256 = vector.multi_reduction <add>, %255, %cst_169 [1] : vector<8x8xf32> to vector<8xf32>
    %257 = vector.shape_cast %256 : vector<8xf32> to vector<8x1xf32>
    %258 = tpu.reciprocal %257 {approx = true} : vector<8x1xf32> -> vector<8x1xf32>
    %259 = vector.broadcast %258 : vector<8x1xf32> to vector<8x8xf32>
    %260 = arith.mulf %255, %259 : vector<8x8xf32>
    %cst_170 = arith.constant dense<0.000000e+00> : vector<8x8xf32>
    %261 = tpu.matmul %260, %248, %cst_170 {dimension_numbers = #tpu.dot_dimension_numbers<[1], [0], [0], [1], [0, 0, 1, 1], [], []>} : vector<8x8xf32>, vector<8x8xf32>, vector<8x8xf32> -> vector<8x8xf32>
    %c0_171 = arith.constant 0 : index
    %c0_172 = arith.constant 0 : index
    %c0_173 = arith.constant 0 : index
    %262 = vector.load %arg21[%c0_171, %c0_172, %c0_173] : memref<4x8x32xf32, #tpu.memory_space<vmem>>, vector<1x8x32xf32>
    %263 = vector.shape_cast %262 : vector<1x8x32xf32> to vector<8x32xf32>
    %cst_174 = arith.constant dense<0.000000e+00> : vector<8x32xf32>
    %264 = tpu.matmul %261, %263, %cst_174 {dimension_numbers = #tpu.dot_dimension_numbers<[1], [0], [0], [1], [0, 0, 1, 1], [], []>} : vector<8x8xf32>, vector<8x32xf32>, vector<8x32xf32> -> vector<8x32xf32>
    %c1_175 = arith.constant 1 : index
    %c0_176 = arith.constant 0 : index
    %c0_177 = arith.constant 0 : index
    %265 = vector.load %arg15[%c1_175, %c0_176, %c0_177] : memref<4x32x8xf32, #tpu.memory_space<vmem>>, vector<1x32x8xf32>
    %266 = vector.shape_cast %265 : vector<1x32x8xf32> to vector<32x8xf32>
    %cst_178 = arith.constant dense<0.000000e+00> : vector<8x8xf32>
    %267 = tpu.matmul %225, %266, %cst_178 {dimension_numbers = #tpu.dot_dimension_numbers<[1], [0], [0], [1], [0, 0, 1, 1], [], []>} : vector<8x32xf32>, vector<32x8xf32>, vector<8x8xf32> -> vector<8x8xf32>
    %c1_179 = arith.constant 1 : index
    %c0_180 = arith.constant 0 : index
    %c0_181 = arith.constant 0 : index
    %268 = vector.load %arg16[%c1_179, %c0_180, %c0_181] : memref<4x1x8xf32, #tpu.memory_space<vmem>>, vector<1x1x8xf32>
    %269 = vector.shape_cast %268 : vector<1x1x8xf32> to vector<1x8xf32>
    %270 = vector.broadcast %269 : vector<1x8xf32> to vector<8x8xf32>
    %271 = arith.addf %267, %270 : vector<8x8xf32>
    %cst_182 = arith.constant 0.353553385 : f32
    %272 = vector.broadcast %cst_182 : f32 to vector<8x8xf32>
    %273 = arith.mulf %271, %272 : vector<8x8xf32>
    %c1_183 = arith.constant 1 : index
    %c0_184 = arith.constant 0 : index
    %c0_185 = arith.constant 0 : index
    %274 = vector.load %arg17[%c1_183, %c0_184, %c0_185] : memref<4x32x8xf32, #tpu.memory_space<vmem>>, vector<1x32x8xf32>
    %275 = vector.shape_cast %274 : vector<1x32x8xf32> to vector<32x8xf32>
    %cst_186 = arith.constant dense<0.000000e+00> : vector<8x8xf32>
    %276 = tpu.matmul %3, %275, %cst_186 {dimension_numbers = #tpu.dot_dimension_numbers<[1], [0], [0], [1], [0, 0, 1, 1], [], []>} : vector<8x32xf32>, vector<32x8xf32>, vector<8x8xf32> -> vector<8x8xf32>
    %c1_187 = arith.constant 1 : index
    %c0_188 = arith.constant 0 : index
    %c0_189 = arith.constant 0 : index
    %277 = vector.load %arg18[%c1_187, %c0_188, %c0_189] : memref<4x1x8xf32, #tpu.memory_space<vmem>>, vector<1x1x8xf32>
    %278 = vector.shape_cast %277 : vector<1x1x8xf32> to vector<1x8xf32>
    %279 = vector.broadcast %278 : vector<1x8xf32> to vector<8x8xf32>
    %280 = arith.addf %276, %279 : vector<8x8xf32>
    %c1_190 = arith.constant 1 : index
    %c0_191 = arith.constant 0 : index
    %c0_192 = arith.constant 0 : index
    %281 = vector.load %arg19[%c1_190, %c0_191, %c0_192] : memref<4x32x8xf32, #tpu.memory_space<vmem>>, vector<1x32x8xf32>
    %282 = vector.shape_cast %281 : vector<1x32x8xf32> to vector<32x8xf32>
    %cst_193 = arith.constant dense<0.000000e+00> : vector<8x8xf32>
    %283 = tpu.matmul %3, %282, %cst_193 {dimension_numbers = #tpu.dot_dimension_numbers<[1], [0], [0], [1], [0, 0, 1, 1], [], []>} : vector<8x32xf32>, vector<32x8xf32>, vector<8x8xf32> -> vector<8x8xf32>
    %c1_194 = arith.constant 1 : index
    %c0_195 = arith.constant 0 : index
    %c0_196 = arith.constant 0 : index
    %284 = vector.load %arg20[%c1_194, %c0_195, %c0_196] : memref<4x1x8xf32, #tpu.memory_space<vmem>>, vector<1x1x8xf32>
    %285 = vector.shape_cast %284 : vector<1x1x8xf32> to vector<1x8xf32>
    %286 = vector.broadcast %285 : vector<1x8xf32> to vector<8x8xf32>
    %287 = arith.addf %283, %286 : vector<8x8xf32>
    %288 = tpu.transpose %280, [1, 0] : vector<8x8xf32> -> vector<8x8xf32>
    %cst_197 = arith.constant dense<0.000000e+00> : vector<8x8xf32>
    %289 = tpu.matmul %273, %288, %cst_197 {dimension_numbers = #tpu.dot_dimension_numbers<[1], [0], [0], [1], [0, 0, 1, 1], [], []>} : vector<8x8xf32>, vector<8x8xf32>, vector<8x8xf32> -> vector<8x8xf32>
    %cst_198 = arith.constant dense<0xFF800000> : vector<8xf32>
    %290 = vector.multi_reduction <maximumf>, %289, %cst_198 [1] : vector<8x8xf32> to vector<8xf32>
    %291 = vector.shape_cast %290 : vector<8xf32> to vector<8x1xf32>
    %292 = vector.broadcast %291 : vector<8x1xf32> to vector<8x8xf32>
    %293 = arith.subf %289, %292 : vector<8x8xf32>
    %294 = math.exp %293 : vector<8x8xf32>
    %cst_199 = arith.constant dense<0.000000e+00> : vector<8xf32>
    %295 = vector.multi_reduction <add>, %294, %cst_199 [1] : vector<8x8xf32> to vector<8xf32>
    %296 = vector.shape_cast %295 : vector<8xf32> to vector<8x1xf32>
    %297 = tpu.reciprocal %296 {approx = true} : vector<8x1xf32> -> vector<8x1xf32>
    %298 = vector.broadcast %297 : vector<8x1xf32> to vector<8x8xf32>
    %299 = arith.mulf %294, %298 : vector<8x8xf32>
    %cst_200 = arith.constant dense<0.000000e+00> : vector<8x8xf32>
    %300 = tpu.matmul %299, %287, %cst_200 {dimension_numbers = #tpu.dot_dimension_numbers<[1], [0], [0], [1], [0, 0, 1, 1], [], []>} : vector<8x8xf32>, vector<8x8xf32>, vector<8x8xf32> -> vector<8x8xf32>
    %c1_201 = arith.constant 1 : index
    %c0_202 = arith.constant 0 : index
    %c0_203 = arith.constant 0 : index
    %301 = vector.load %arg21[%c1_201, %c0_202, %c0_203] : memref<4x8x32xf32, #tpu.memory_space<vmem>>, vector<1x8x32xf32>
    %302 = vector.shape_cast %301 : vector<1x8x32xf32> to vector<8x32xf32>
    %cst_204 = arith.constant dense<0.000000e+00> : vector<8x32xf32>
    %303 = tpu.matmul %300, %302, %cst_204 {dimension_numbers = #tpu.dot_dimension_numbers<[1], [0], [0], [1], [0, 0, 1, 1], [], []>} : vector<8x8xf32>, vector<8x32xf32>, vector<8x32xf32> -> vector<8x32xf32>
    %304 = arith.addf %264, %303 : vector<8x32xf32>
    %c2_205 = arith.constant 2 : index
    %c0_206 = arith.constant 0 : index
    %c0_207 = arith.constant 0 : index
    %305 = vector.load %arg15[%c2_205, %c0_206, %c0_207] : memref<4x32x8xf32, #tpu.memory_space<vmem>>, vector<1x32x8xf32>
    %306 = vector.shape_cast %305 : vector<1x32x8xf32> to vector<32x8xf32>
    %cst_208 = arith.constant dense<0.000000e+00> : vector<8x8xf32>
    %307 = tpu.matmul %225, %306, %cst_208 {dimension_numbers = #tpu.dot_dimension_numbers<[1], [0], [0], [1], [0, 0, 1, 1], [], []>} : vector<8x32xf32>, vector<32x8xf32>, vector<8x8xf32> -> vector<8x8xf32>
    %c2_209 = arith.constant 2 : index
    %c0_210 = arith.constant 0 : index
    %c0_211 = arith.constant 0 : index
    %308 = vector.load %arg16[%c2_209, %c0_210, %c0_211] : memref<4x1x8xf32, #tpu.memory_space<vmem>>, vector<1x1x8xf32>
    %309 = vector.shape_cast %308 : vector<1x1x8xf32> to vector<1x8xf32>
    %310 = vector.broadcast %309 : vector<1x8xf32> to vector<8x8xf32>
    %311 = arith.addf %307, %310 : vector<8x8xf32>
    %cst_212 = arith.constant 0.353553385 : f32
    %312 = vector.broadcast %cst_212 : f32 to vector<8x8xf32>
    %313 = arith.mulf %311, %312 : vector<8x8xf32>
    %c2_213 = arith.constant 2 : index
    %c0_214 = arith.constant 0 : index
    %c0_215 = arith.constant 0 : index
    %314 = vector.load %arg17[%c2_213, %c0_214, %c0_215] : memref<4x32x8xf32, #tpu.memory_space<vmem>>, vector<1x32x8xf32>
    %315 = vector.shape_cast %314 : vector<1x32x8xf32> to vector<32x8xf32>
    %cst_216 = arith.constant dense<0.000000e+00> : vector<8x8xf32>
    %316 = tpu.matmul %3, %315, %cst_216 {dimension_numbers = #tpu.dot_dimension_numbers<[1], [0], [0], [1], [0, 0, 1, 1], [], []>} : vector<8x32xf32>, vector<32x8xf32>, vector<8x8xf32> -> vector<8x8xf32>
    %c2_217 = arith.constant 2 : index
    %c0_218 = arith.constant 0 : index
    %c0_219 = arith.constant 0 : index
    %317 = vector.load %arg18[%c2_217, %c0_218, %c0_219] : memref<4x1x8xf32, #tpu.memory_space<vmem>>, vector<1x1x8xf32>
    %318 = vector.shape_cast %317 : vector<1x1x8xf32> to vector<1x8xf32>
    %319 = vector.broadcast %318 : vector<1x8xf32> to vector<8x8xf32>
    %320 = arith.addf %316, %319 : vector<8x8xf32>
    %c2_220 = arith.constant 2 : index
    %c0_221 = arith.constant 0 : index
    %c0_222 = arith.constant 0 : index
    %321 = vector.load %arg19[%c2_220, %c0_221, %c0_222] : memref<4x32x8xf32, #tpu.memory_space<vmem>>, vector<1x32x8xf32>
    %322 = vector.shape_cast %321 : vector<1x32x8xf32> to vector<32x8xf32>
    %cst_223 = arith.constant dense<0.000000e+00> : vector<8x8xf32>
    %323 = tpu.matmul %3, %322, %cst_223 {dimension_numbers = #tpu.dot_dimension_numbers<[1], [0], [0], [1], [0, 0, 1, 1], [], []>} : vector<8x32xf32>, vector<32x8xf32>, vector<8x8xf32> -> vector<8x8xf32>
    %c2_224 = arith.constant 2 : index
    %c0_225 = arith.constant 0 : index
    %c0_226 = arith.constant 0 : index
    %324 = vector.load %arg20[%c2_224, %c0_225, %c0_226] : memref<4x1x8xf32, #tpu.memory_space<vmem>>, vector<1x1x8xf32>
    %325 = vector.shape_cast %324 : vector<1x1x8xf32> to vector<1x8xf32>
    %326 = vector.broadcast %325 : vector<1x8xf32> to vector<8x8xf32>
    %327 = arith.addf %323, %326 : vector<8x8xf32>
    %328 = tpu.transpose %320, [1, 0] : vector<8x8xf32> -> vector<8x8xf32>
    %cst_227 = arith.constant dense<0.000000e+00> : vector<8x8xf32>
    %329 = tpu.matmul %313, %328, %cst_227 {dimension_numbers = #tpu.dot_dimension_numbers<[1], [0], [0], [1], [0, 0, 1, 1], [], []>} : vector<8x8xf32>, vector<8x8xf32>, vector<8x8xf32> -> vector<8x8xf32>
    %cst_228 = arith.constant dense<0xFF800000> : vector<8xf32>
    %330 = vector.multi_reduction <maximumf>, %329, %cst_228 [1] : vector<8x8xf32> to vector<8xf32>
    %331 = vector.shape_cast %330 : vector<8xf32> to vector<8x1xf32>
    %332 = vector.broadcast %331 : vector<8x1xf32> to vector<8x8xf32>
    %333 = arith.subf %329, %332 : vector<8x8xf32>
    %334 = math.exp %333 : vector<8x8xf32>
    %cst_229 = arith.constant dense<0.000000e+00> : vector<8xf32>
    %335 = vector.multi_reduction <add>, %334, %cst_229 [1] : vector<8x8xf32> to vector<8xf32>
    %336 = vector.shape_cast %335 : vector<8xf32> to vector<8x1xf32>
    %337 = tpu.reciprocal %336 {approx = true} : vector<8x1xf32> -> vector<8x1xf32>
    %338 = vector.broadcast %337 : vector<8x1xf32> to vector<8x8xf32>
    %339 = arith.mulf %334, %338 : vector<8x8xf32>
    %cst_230 = arith.constant dense<0.000000e+00> : vector<8x8xf32>
    %340 = tpu.matmul %339, %327, %cst_230 {dimension_numbers = #tpu.dot_dimension_numbers<[1], [0], [0], [1], [0, 0, 1, 1], [], []>} : vector<8x8xf32>, vector<8x8xf32>, vector<8x8xf32> -> vector<8x8xf32>
    %c2_231 = arith.constant 2 : index
    %c0_232 = arith.constant 0 : index
    %c0_233 = arith.constant 0 : index
    %341 = vector.load %arg21[%c2_231, %c0_232, %c0_233] : memref<4x8x32xf32, #tpu.memory_space<vmem>>, vector<1x8x32xf32>
    %342 = vector.shape_cast %341 : vector<1x8x32xf32> to vector<8x32xf32>
    %cst_234 = arith.constant dense<0.000000e+00> : vector<8x32xf32>
    %343 = tpu.matmul %340, %342, %cst_234 {dimension_numbers = #tpu.dot_dimension_numbers<[1], [0], [0], [1], [0, 0, 1, 1], [], []>} : vector<8x8xf32>, vector<8x32xf32>, vector<8x32xf32> -> vector<8x32xf32>
    %344 = arith.addf %304, %343 : vector<8x32xf32>
    %c3_235 = arith.constant 3 : index
    %c0_236 = arith.constant 0 : index
    %c0_237 = arith.constant 0 : index
    %345 = vector.load %arg15[%c3_235, %c0_236, %c0_237] : memref<4x32x8xf32, #tpu.memory_space<vmem>>, vector<1x32x8xf32>
    %346 = vector.shape_cast %345 : vector<1x32x8xf32> to vector<32x8xf32>
    %cst_238 = arith.constant dense<0.000000e+00> : vector<8x8xf32>
    %347 = tpu.matmul %225, %346, %cst_238 {dimension_numbers = #tpu.dot_dimension_numbers<[1], [0], [0], [1], [0, 0, 1, 1], [], []>} : vector<8x32xf32>, vector<32x8xf32>, vector<8x8xf32> -> vector<8x8xf32>
    %c3_239 = arith.constant 3 : index
    %c0_240 = arith.constant 0 : index
    %c0_241 = arith.constant 0 : index
    %348 = vector.load %arg16[%c3_239, %c0_240, %c0_241] : memref<4x1x8xf32, #tpu.memory_space<vmem>>, vector<1x1x8xf32>
    %349 = vector.shape_cast %348 : vector<1x1x8xf32> to vector<1x8xf32>
    %350 = vector.broadcast %349 : vector<1x8xf32> to vector<8x8xf32>
    %351 = arith.addf %347, %350 : vector<8x8xf32>
    %cst_242 = arith.constant 0.353553385 : f32
    %352 = vector.broadcast %cst_242 : f32 to vector<8x8xf32>
    %353 = arith.mulf %351, %352 : vector<8x8xf32>
    %c3_243 = arith.constant 3 : index
    %c0_244 = arith.constant 0 : index
    %c0_245 = arith.constant 0 : index
    %354 = vector.load %arg17[%c3_243, %c0_244, %c0_245] : memref<4x32x8xf32, #tpu.memory_space<vmem>>, vector<1x32x8xf32>
    %355 = vector.shape_cast %354 : vector<1x32x8xf32> to vector<32x8xf32>
    %cst_246 = arith.constant dense<0.000000e+00> : vector<8x8xf32>
    %356 = tpu.matmul %3, %355, %cst_246 {dimension_numbers = #tpu.dot_dimension_numbers<[1], [0], [0], [1], [0, 0, 1, 1], [], []>} : vector<8x32xf32>, vector<32x8xf32>, vector<8x8xf32> -> vector<8x8xf32>
    %c3_247 = arith.constant 3 : index
    %c0_248 = arith.constant 0 : index
    %c0_249 = arith.constant 0 : index
    %357 = vector.load %arg18[%c3_247, %c0_248, %c0_249] : memref<4x1x8xf32, #tpu.memory_space<vmem>>, vector<1x1x8xf32>
    %358 = vector.shape_cast %357 : vector<1x1x8xf32> to vector<1x8xf32>
    %359 = vector.broadcast %358 : vector<1x8xf32> to vector<8x8xf32>
    %360 = arith.addf %356, %359 : vector<8x8xf32>
    %c3_250 = arith.constant 3 : index
    %c0_251 = arith.constant 0 : index
    %c0_252 = arith.constant 0 : index
    %361 = vector.load %arg19[%c3_250, %c0_251, %c0_252] : memref<4x32x8xf32, #tpu.memory_space<vmem>>, vector<1x32x8xf32>
    %362 = vector.shape_cast %361 : vector<1x32x8xf32> to vector<32x8xf32>
    %cst_253 = arith.constant dense<0.000000e+00> : vector<8x8xf32>
    %363 = tpu.matmul %3, %362, %cst_253 {dimension_numbers = #tpu.dot_dimension_numbers<[1], [0], [0], [1], [0, 0, 1, 1], [], []>} : vector<8x32xf32>, vector<32x8xf32>, vector<8x8xf32> -> vector<8x8xf32>
    %c3_254 = arith.constant 3 : index
    %c0_255 = arith.constant 0 : index
    %c0_256 = arith.constant 0 : index
    %364 = vector.load %arg20[%c3_254, %c0_255, %c0_256] : memref<4x1x8xf32, #tpu.memory_space<vmem>>, vector<1x1x8xf32>
    %365 = vector.shape_cast %364 : vector<1x1x8xf32> to vector<1x8xf32>
    %366 = vector.broadcast %365 : vector<1x8xf32> to vector<8x8xf32>
    %367 = arith.addf %363, %366 : vector<8x8xf32>
    %368 = tpu.transpose %360, [1, 0] : vector<8x8xf32> -> vector<8x8xf32>
    %cst_257 = arith.constant dense<0.000000e+00> : vector<8x8xf32>
    %369 = tpu.matmul %353, %368, %cst_257 {dimension_numbers = #tpu.dot_dimension_numbers<[1], [0], [0], [1], [0, 0, 1, 1], [], []>} : vector<8x8xf32>, vector<8x8xf32>, vector<8x8xf32> -> vector<8x8xf32>
    %cst_258 = arith.constant dense<0xFF800000> : vector<8xf32>
    %370 = vector.multi_reduction <maximumf>, %369, %cst_258 [1] : vector<8x8xf32> to vector<8xf32>
    %371 = vector.shape_cast %370 : vector<8xf32> to vector<8x1xf32>
    %372 = vector.broadcast %371 : vector<8x1xf32> to vector<8x8xf32>
    %373 = arith.subf %369, %372 : vector<8x8xf32>
    %374 = math.exp %373 : vector<8x8xf32>
    %cst_259 = arith.constant dense<0.000000e+00> : vector<8xf32>
    %375 = vector.multi_reduction <add>, %374, %cst_259 [1] : vector<8x8xf32> to vector<8xf32>
    %376 = vector.shape_cast %375 : vector<8xf32> to vector<8x1xf32>
    %377 = tpu.reciprocal %376 {approx = true} : vector<8x1xf32> -> vector<8x1xf32>
    %378 = vector.broadcast %377 : vector<8x1xf32> to vector<8x8xf32>
    %379 = arith.mulf %374, %378 : vector<8x8xf32>
    %cst_260 = arith.constant dense<0.000000e+00> : vector<8x8xf32>
    %380 = tpu.matmul %379, %367, %cst_260 {dimension_numbers = #tpu.dot_dimension_numbers<[1], [0], [0], [1], [0, 0, 1, 1], [], []>} : vector<8x8xf32>, vector<8x8xf32>, vector<8x8xf32> -> vector<8x8xf32>
    %c3_261 = arith.constant 3 : index
    %c0_262 = arith.constant 0 : index
    %c0_263 = arith.constant 0 : index
    %381 = vector.load %arg21[%c3_261, %c0_262, %c0_263] : memref<4x8x32xf32, #tpu.memory_space<vmem>>, vector<1x8x32xf32>
    %382 = vector.shape_cast %381 : vector<1x8x32xf32> to vector<8x32xf32>
    %cst_264 = arith.constant dense<0.000000e+00> : vector<8x32xf32>
    %383 = tpu.matmul %380, %382, %cst_264 {dimension_numbers = #tpu.dot_dimension_numbers<[1], [0], [0], [1], [0, 0, 1, 1], [], []>} : vector<8x8xf32>, vector<8x32xf32>, vector<8x32xf32> -> vector<8x32xf32>
    %384 = arith.addf %344, %383 : vector<8x32xf32>
    %c0_265 = arith.constant 0 : index
    %c0_266 = arith.constant 0 : index
    %385 = vector.load %arg22[%c0_265, %c0_266] : memref<1x32xf32, #tpu.memory_space<vmem>>, vector<1x32xf32>
    %386 = vector.broadcast %385 : vector<1x32xf32> to vector<8x32xf32>
    %387 = arith.addf %384, %386 : vector<8x32xf32>
    %388 = arith.addf %201, %387 : vector<8x32xf32>
    %c0_267 = arith.constant 0 : index
    %c0_268 = arith.constant 0 : index
    %389 = vector.load %arg23[%c0_267, %c0_268] : memref<1x32xf32, #tpu.memory_space<vmem>>, vector<1x32xf32>
    %c0_269 = arith.constant 0 : index
    %c0_270 = arith.constant 0 : index
    %390 = vector.load %arg24[%c0_269, %c0_270] : memref<1x32xf32, #tpu.memory_space<vmem>>, vector<1x32xf32>
    %cst_271 = arith.constant dense<0.000000e+00> : vector<8xf32>
    %391 = vector.multi_reduction <add>, %388, %cst_271 [1] : vector<8x32xf32> to vector<8xf32>
    %392 = vector.shape_cast %391 : vector<8xf32> to vector<8x1xf32>
    %cst_272 = arith.constant 3.200000e+01 : f32
    %393 = vector.broadcast %cst_272 : f32 to vector<8x1xf32>
    %394 = arith.divf %392, %393 : vector<8x1xf32>
    %395 = vector.broadcast %394 : vector<8x1xf32> to vector<8x32xf32>
    %396 = arith.subf %388, %395 : vector<8x32xf32>
    %397 = arith.mulf %396, %396 : vector<8x32xf32>
    %cst_273 = arith.constant dense<0.000000e+00> : vector<8xf32>
    %398 = vector.multi_reduction <add>, %397, %cst_273 [1] : vector<8x32xf32> to vector<8xf32>
    %399 = vector.shape_cast %398 : vector<8xf32> to vector<8x1xf32>
    %cst_274 = arith.constant 3.200000e+01 : f32
    %400 = vector.broadcast %cst_274 : f32 to vector<8x1xf32>
    %401 = arith.divf %399, %400 : vector<8x1xf32>
    %402 = vector.broadcast %394 : vector<8x1xf32> to vector<8x32xf32>
    %403 = arith.subf %388, %402 : vector<8x32xf32>
    %cst_275 = arith.constant 9.99999974E-6 : f32
    %404 = vector.broadcast %cst_275 : f32 to vector<8x1xf32>
    %405 = arith.addf %401, %404 : vector<8x1xf32>
    %406 = math.rsqrt %405 : vector<8x1xf32>
    %407 = vector.broadcast %406 : vector<8x1xf32> to vector<8x32xf32>
    %408 = arith.mulf %403, %407 : vector<8x32xf32>
    %409 = vector.broadcast %389 : vector<1x32xf32> to vector<8x32xf32>
    %410 = arith.mulf %408, %409 : vector<8x32xf32>
    %411 = vector.broadcast %390 : vector<1x32xf32> to vector<8x32xf32>
    %412 = arith.addf %410, %411 : vector<8x32xf32>
    %c0_276 = arith.constant 0 : index
    %c0_277 = arith.constant 0 : index
    %413 = vector.load %arg25[%c0_276, %c0_277] : memref<32x128xf32, #tpu.memory_space<vmem>>, vector<32x128xf32>
    %cst_278 = arith.constant dense<0.000000e+00> : vector<8x128xf32>
    %414 = tpu.matmul %412, %413, %cst_278 {dimension_numbers = #tpu.dot_dimension_numbers<[1], [0], [0], [1], [0, 0, 1, 1], [], []>} : vector<8x32xf32>, vector<32x128xf32>, vector<8x128xf32> -> vector<8x128xf32>
    %c0_279 = arith.constant 0 : index
    %c0_280 = arith.constant 0 : index
    %415 = vector.load %arg26[%c0_279, %c0_280] : memref<1x128xf32, #tpu.memory_space<vmem>>, vector<1x128xf32>
    %416 = vector.broadcast %415 : vector<1x128xf32> to vector<8x128xf32>
    %417 = arith.addf %414, %416 : vector<8x128xf32>
    %cst_281 = arith.constant 5.000000e-01 : f32
    %418 = vector.broadcast %cst_281 : f32 to vector<8x128xf32>
    %419 = arith.mulf %418, %417 : vector<8x128xf32>
    %cst_282 = arith.constant 0.707106769 : f32
    %420 = vector.broadcast %cst_282 : f32 to vector<8x128xf32>
    %421 = arith.mulf %417, %420 : vector<8x128xf32>
    %422 = math.erf %421 : vector<8x128xf32>
    %cst_283 = arith.constant 1.000000e+00 : f32
    %423 = vector.broadcast %cst_283 : f32 to vector<8x128xf32>
    %424 = arith.addf %423, %422 : vector<8x128xf32>
    %425 = arith.mulf %419, %424 : vector<8x128xf32>
    %c0_284 = arith.constant 0 : index
    %c0_285 = arith.constant 0 : index
    %426 = vector.load %arg27[%c0_284, %c0_285] : memref<128x32xf32, #tpu.memory_space<vmem>>, vector<128x32xf32>
    %cst_286 = arith.constant dense<0.000000e+00> : vector<8x32xf32>
    %427 = tpu.matmul %425, %426, %cst_286 {dimension_numbers = #tpu.dot_dimension_numbers<[1], [0], [0], [1], [0, 0, 1, 1], [], []>} : vector<8x128xf32>, vector<128x32xf32>, vector<8x32xf32> -> vector<8x32xf32>
    %c0_287 = arith.constant 0 : index
    %c0_288 = arith.constant 0 : index
    %428 = vector.load %arg28[%c0_287, %c0_288] : memref<1x32xf32, #tpu.memory_space<vmem>>, vector<1x32xf32>
    %429 = vector.broadcast %428 : vector<1x32xf32> to vector<8x32xf32>
    %430 = arith.addf %427, %429 : vector<8x32xf32>
    %431 = arith.addf %388, %430 : vector<8x32xf32>
    %c0_289 = arith.constant 0 : index
    %c0_290 = arith.constant 0 : index
    %c0_291 = arith.constant 0 : index
    %432 = vector.load %arg29[%c0_289, %c0_290, %c0_291] : memref<1x8x32xf32, #tpu.memory_space<vmem>>, vector<1x8x32xf32>
    %433 = vector.shape_cast %432 : vector<1x8x32xf32> to vector<8x32xf32>
    %434 = vector.shape_cast %431 : vector<8x32xf32> to vector<1x8x32xf32>
    tpu.vector_store %arg29[%c0_289, %c0_290, %c0_291], %434 {strides = array<i32>} : memref<1x8x32xf32, #tpu.memory_space<vmem>>, vector<1x8x32xf32>,
    return
  }
  func.func @transform_0(%arg0: i32) -> (i32, i32, i32) {
    %c0_i32 = arith.constant 0 : i32
    %c0_i32_0 = arith.constant 0 : i32
    %c0_i32_1 = arith.constant 0 : i32
    return %arg0, %c0_i32, %c0_i32_0 : i32, i32, i32
  }
  func.func @transform_1(%arg0: i32) -> (i32, i32, i32) {
    %c0_i32 = arith.constant 0 : i32
    %c0_i32_0 = arith.constant 0 : i32
    %c0_i32_1 = arith.constant 0 : i32
    return %arg0, %c0_i32, %c0_i32_0 : i32, i32, i32
  }
  func.func @transform_2(%arg0: i32) -> (i32, i32) {
    %c0_i32 = arith.constant 0 : i32
    %c0_i32_0 = arith.constant 0 : i32
    %c0_i32_1 = arith.constant 0 : i32
    return %c0_i32, %c0_i32_0 : i32, i32
  }
  func.func @transform_3(%arg0: i32) -> (i32, i32) {
    %c0_i32 = arith.constant 0 : i32
    %c0_i32_0 = arith.constant 0 : i32
    %c0_i32_1 = arith.constant 0 : i32
    return %c0_i32, %c0_i32_0 : i32, i32
  }
  func.func @transform_4(%arg0: i32) -> (i32, i32, i32) {
    %c0_i32 = arith.constant 0 : i32
    %c0_i32_0 = arith.constant 0 : i32
    %c0_i32_1 = arith.constant 0 : i32
    %c0_i32_2 = arith.constant 0 : i32
    return %c0_i32, %c0_i32_0, %c0_i32_1 : i32, i32, i32
  }
  func.func @transform_5(%arg0: i32) -> (i32, i32, i32) {
    %c0_i32 = arith.constant 0 : i32
    %c0_i32_0 = arith.constant 0 : i32
    %c0_i32_1 = arith.constant 0 : i32
    %c0_i32_2 = arith.constant 0 : i32
    return %c0_i32, %c0_i32_0, %c0_i32_1 : i32, i32, i32
  }
  func.func @transform_6(%arg0: i32) -> (i32, i32, i32) {
    %c0_i32 = arith.constant 0 : i32
    %c0_i32_0 = arith.constant 0 : i32
    %c0_i32_1 = arith.constant 0 : i32
    %c0_i32_2 = arith.constant 0 : i32
    return %c0_i32, %c0_i32_0, %c0_i32_1 : i32, i32, i32
  }
  func.func @transform_7(%arg0: i32) -> (i32, i32, i32) {
    %c0_i32 = arith.constant 0 : i32
    %c0_i32_0 = arith.constant 0 : i32
    %c0_i32_1 = arith.constant 0 : i32
    %c0_i32_2 = arith.constant 0 : i32
    return %c0_i32, %c0_i32_0, %c0_i32_1 : i32, i32, i32
  }
  func.func @transform_8(%arg0: i32) -> (i32, i32, i32) {
    %c0_i32 = arith.constant 0 : i32
    %c0_i32_0 = arith.constant 0 : i32
    %c0_i32_1 = arith.constant 0 : i32
    %c0_i32_2 = arith.constant 0 : i32
    return %c0_i32, %c0_i32_0, %c0_i32_1 : i32, i32, i32
  }
  func.func @transform_9(%arg0: i32) -> (i32, i32, i32) {
    %c0_i32 = arith.constant 0 : i32
    %c0_i32_0 = arith.constant 0 : i32
    %c0_i32_1 = arith.constant 0 : i32
    %c0_i32_2 = arith.constant 0 : i32
    return %c0_i32, %c0_i32_0, %c0_i32_1 : i32, i32, i32
  }
  func.func @transform_10(%arg0: i32) -> (i32, i32, i32) {
    %c0_i32 = arith.constant 0 : i32
    %c0_i32_0 = arith.constant 0 : i32
    %c0_i32_1 = arith.constant 0 : i32
    %c0_i32_2 = arith.constant 0 : i32
    return %c0_i32, %c0_i32_0, %c0_i32_1 : i32, i32, i32
  }
  func.func @transform_11(%arg0: i32) -> (i32, i32) {
    %c0_i32 = arith.constant 0 : i32
    %c0_i32_0 = arith.constant 0 : i32
    %c0_i32_1 = arith.constant 0 : i32
    return %c0_i32, %c0_i32_0 : i32, i32
  }
  func.func @transform_12(%arg0: i32) -> (i32, i32) {
    %c0_i32 = arith.constant 0 : i32
    %c0_i32_0 = arith.constant 0 : i32
    %c0_i32_1 = arith.constant 0 : i32
    return %c0_i32, %c0_i32_0 : i32, i32
  }
  func.func @transform_13(%arg0: i32) -> (i32, i32) {
    %c0_i32 = arith.constant 0 : i32
    %c0_i32_0 = arith.constant 0 : i32
    %c0_i32_1 = arith.constant 0 : i32
    return %c0_i32, %c0_i32_0 : i32, i32
  }
  func.func @transform_14(%arg0: i32) -> (i32, i32, i32) {
    %c0_i32 = arith.constant 0 : i32
    %c0_i32_0 = arith.constant 0 : i32
    %c0_i32_1 = arith.constant 0 : i32
    %c0_i32_2 = arith.constant 0 : i32
    return %c0_i32, %c0_i32_0, %c0_i32_1 : i32, i32, i32
  }
  func.func @transform_15(%arg0: i32) -> (i32, i32, i32) {
    %c0_i32 = arith.constant 0 : i32
    %c0_i32_0 = arith.constant 0 : i32
    %c0_i32_1 = arith.constant 0 : i32
    %c0_i32_2 = arith.constant 0 : i32
    return %c0_i32, %c0_i32_0, %c0_i32_1 : i32, i32, i32
  }
  func.func @transform_16(%arg0: i32) -> (i32, i32, i32) {
    %c0_i32 = arith.constant 0 : i32
    %c0_i32_0 = arith.constant 0 : i32
    %c0_i32_1 = arith.constant 0 : i32
    %c0_i32_2 = arith.constant 0 : i32
    return %c0_i32, %c0_i32_0, %c0_i32_1 : i32, i32, i32
  }
  func.func @transform_17(%arg0: i32) -> (i32, i32, i32) {
    %c0_i32 = arith.constant 0 : i32
    %c0_i32_0 = arith.constant 0 : i32
    %c0_i32_1 = arith.constant 0 : i32
    %c0_i32_2 = arith.constant 0 : i32
    return %c0_i32, %c0_i32_0, %c0_i32_1 : i32, i32, i32
  }
  func.func @transform_18(%arg0: i32) -> (i32, i32, i32) {
    %c0_i32 = arith.constant 0 : i32
    %c0_i32_0 = arith.constant 0 : i32
    %c0_i32_1 = arith.constant 0 : i32
    %c0_i32_2 = arith.constant 0 : i32
    return %c0_i32, %c0_i32_0, %c0_i32_1 : i32, i32, i32
  }
  func.func @transform_19(%arg0: i32) -> (i32, i32, i32) {
    %c0_i32 = arith.constant 0 : i32
    %c0_i32_0 = arith.constant 0 : i32
    %c0_i32_1 = arith.constant 0 : i32
    %c0_i32_2 = arith.constant 0 : i32
    return %c0_i32, %c0_i32_0, %c0_i32_1 : i32, i32, i32
  }
  func.func @transform_20(%arg0: i32) -> (i32, i32, i32) {
    %c0_i32 = arith.constant 0 : i32
    %c0_i32_0 = arith.constant 0 : i32
    %c0_i32_1 = arith.constant 0 : i32
    %c0_i32_2 = arith.constant 0 : i32
    return %c0_i32, %c0_i32_0, %c0_i32_1 : i32, i32, i32
  }
  func.func @transform_21(%arg0: i32) -> (i32, i32) {
    %c0_i32 = arith.constant 0 : i32
    %c0_i32_0 = arith.constant 0 : i32
    %c0_i32_1 = arith.constant 0 : i32
    return %c0_i32, %c0_i32_0 : i32, i32
  }
  func.func @transform_22(%arg0: i32) -> (i32, i32) {
    %c0_i32 = arith.constant 0 : i32
    %c0_i32_0 = arith.constant 0 : i32
    %c0_i32_1 = arith.constant 0 : i32
    return %c0_i32, %c0_i32_0 : i32, i32
  }
  func.func @transform_23(%arg0: i32) -> (i32, i32) {
    %c0_i32 = arith.constant 0 : i32
    %c0_i32_0 = arith.constant 0 : i32
    %c0_i32_1 = arith.constant 0 : i32
    return %c0_i32, %c0_i32_0 : i32, i32
  }
  func.func @transform_24(%arg0: i32) -> (i32, i32) {
    %c0_i32 = arith.constant 0 : i32
    %c0_i32_0 = arith.constant 0 : i32
    %c0_i32_1 = arith.constant 0 : i32
    return %c0_i32, %c0_i32_0 : i32, i32
  }
  func.func @transform_25(%arg0: i32) -> (i32, i32) {
    %c0_i32 = arith.constant 0 : i32
    %c0_i32_0 = arith.constant 0 : i32
    %c0_i32_1 = arith.constant 0 : i32
    return %c0_i32, %c0_i32_0 : i32, i32
  }
  func.func @transform_26(%arg0: i32) -> (i32, i32) {
    %c0_i32 = arith.constant 0 : i32
    %c0_i32_0 = arith.constant 0 : i32
    %c0_i32_1 = arith.constant 0 : i32
    return %c0_i32, %c0_i32_0 : i32, i32
  }
  func.func @transform_27(%arg0: i32) -> (i32, i32) {
    %c0_i32 = arith.constant 0 : i32
    %c0_i32_0 = arith.constant 0 : i32
    %c0_i32_1 = arith.constant 0 : i32
    return %c0_i32, %c0_i32_0 : i32, i32
  }
  func.func @transform_28(%arg0: i32) -> (i32, i32, i32) {
    %c0_i32 = arith.constant 0 : i32
    %c0_i32_0 = arith.constant 0 : i32
    %c0_i32_1 = arith.constant 0 : i32
    return %arg0, %c0_i32, %c0_i32_0 : i32, i32, i32
  }
}

</mosaic_0001>

<bundles_post_ra>
// kernel: tpu_custom_call.1
= control target key start
LH: loop header
LB: loop body
LE: loop exit
PB: predicated region body
PF: predicated region fallthrough
CT: control target
= control target key end

     0   :  { %s3812_s0 = inlined_call_operand.vmem [shape: f32[2,8,32], index: 0, kind: input, shape index: {}]   ;;  %s3813_s1 = inlined_call_operand.vmem [shape: f32[2,8,32], index: 1, kind: input, shape index: {}]   ;;  %s3814_s2 = inlined_call_operand.vmem [shape: f32[1,32], index: 2, kind: input, shape index: {}]   ;;  %s3815_s3 = inlined_call_operand.vmem [shape: f32[1,32], index: 3, kind: input, shape index: {}]   ;;  %s3816_s4 = inlined_call_operand.vmem [shape: f32[4,32,8], index: 4, kind: input, shape index: {}]   ;;  %s3817_s5 = inlined_call_operand.vmem [shape: f32[4,1,8], index: 5, kind: input, shape index: {}]   ;;  %s3818_s6 = inlined_call_operand.vmem [shape: f32[4,32,8], index: 6, kind: input, shape index: {}]   ;;  %s3819_s7 = inlined_call_operand.vmem [shape: f32[4,1,8], index: 7, kind: input, shape index: {}]   ;;  %s3820_s8 = inlined_call_operand.vmem [shape: f32[4,32,8], index: 8, kind: input, shape index: {}]   ;;  %s3821_s9 = inlined_call_operand.vmem [shape: f32[4,1,8], index: 9, kind: input, shape index: {}]   ;;  %s3822_s10 = inlined_call_operand.vmem [shape: f32[4,8,32], index: 10, kind: input, shape index: {}]   ;;  %s3823_s11 = inlined_call_operand.vmem [shape: f32[1,32], index: 11, kind: input, shape index: {}]   ;;  %s3824_s12 = inlined_call_operand.vmem [shape: f32[1,32], index: 12, kind: input, shape index: {}]   ;;  %s3825_s13 = inlined_call_operand.vmem [shape: f32[1,32], index: 13, kind: input, shape index: {}]   ;;  %s3826_s14 = inlined_call_operand.vmem [shape: f32[4,32,8], index: 14, kind: input, shape index: {}]   ;;  %s3827_s15 = inlined_call_operand.vmem [shape: f32[4,1,8], index: 15, kind: input, shape index: {}]   ;;  %s3828_s16 = inlined_call_operand.vmem [shape: f32[4,32,8], index: 16, kind: input, shape index: {}]   ;;  %s3829_s17 = inlined_call_operand.vmem [shape: f32[4,1,8], index: 17, kind: input, shape index: {}]   ;;  %s3830_s18 = inlined_call_operand.vmem [shape: f32[4,32,8], index: 18, kind: input, shape index: {}]   ;;  %s3831_s19 = inlined_call_operand.vmem [shape: f32[4,1,8], index: 19, kind: input, shape index: {}]   ;;  %s3832_s20 = inlined_call_operand.vmem [shape: f32[4,8,32], index: 20, kind: input, shape index: {}]   ;;  %s3833_s21 = inlined_call_operand.vmem [shape: f32[1,32], index: 21, kind: input, shape index: {}]   ;;  %s3834_s22 = inlined_call_operand.vmem [shape: f32[1,32], index: 22, kind: input, shape index: {}]   ;;  %s3835_s23 = inlined_call_operand.vmem [shape: f32[1,32], index: 23, kind: input, shape index: {}]   ;;  %s3836_s24 = inlined_call_operand.vmem [shape: f32[32,128], index: 24, kind: input, shape index: {}]   ;;  %s3837_s25 = inlined_call_operand.vmem [shape: f32[1,128], index: 25, kind: input, shape index: {}]   ;;  %s3838_s26 = inlined_call_operand.vmem [shape: f32[128,32], index: 26, kind: input, shape index: {}]   ;;  %s3839_s27 = inlined_call_operand.vmem [shape: f32[1,32], index: 27, kind: input, shape index: {}]   ;;  %s3840_s28 = inlined_call_operand.hbm [shape: f32[2,8,32], index: 28, kind: output, shape index: {}]  }
   0x1   :  { %3865 = sst [smem:[#allocation14_spill]] %s3812_s0 }
   0x2   :  { %3866 = sst [smem:[#allocation15_spill]] %s3813_s1 }
   0x3   :  { %3867 = sst [smem:[#allocation16_spill]] %s3814_s2 }
   0x4   :  { %3868 = sst [smem:[#allocation17_spill]] %s3815_s3 }
   0x5   :  { %3869 = sst [smem:[#allocation18_spill]] %s3816_s4 }
   0x6   :  { %3870 = sst [smem:[#allocation19_spill]] %s3817_s5 }
   0x7   :  { %3871 = sst [smem:[#allocation20_spill]] %s3818_s6 }
   0x8   :  { %3872 = sst [smem:[#allocation21_spill]] %s3819_s7 }
   0x9   :  { %3873 = sst [smem:[#allocation22_spill]] %s3820_s8 }
   0xa   :  { %3874 = sst [smem:[#allocation23_spill]] %s3821_s9 }
   0xb   :  { %3875 = sst [smem:[#allocation24_spill]] %s3822_s10 }
   0xc   :  { %3876 = sst [smem:[#allocation25_spill]] %s3823_s11 }
   0xd   :  { %3877 = sst [smem:[#allocation26_spill]] %s3824_s12 }
   0xe   :  { %3878 = sst [smem:[#allocation27_spill]] %s3837_s25 }
   0xf   :  { %3879 = sst [smem:[#allocation28_spill]] %s3839_s27 }
  0x10   :  { %3880 = sst [smem:[#allocation29_spill]] %s3840_s28 }
  0x11   :  { %33 = vsyncpa [#allocation3], 0 }
  0x12   :  { %35 = vsyncpa [#allocation3 + $0x1], 0  ;;  %s3088_s8 = smov 0   ;;  %s3090_s5 = smov 0  }
  0x13   :  { %s3092_s9 = smov 0   ;;  %s3094_s30 = smov 0  }
  0x14 LB: > { %3881 = sst [smem:[#allocation5_spill]] %s2928_s8  ;;  %s3109_s3 = sadd.s32 4294967295, %s2940_s30   ;;  %s2940_s30 = sphi %s3094_s30, %s3918_s30   ;;  %s2936_s9 = sphi %s3092_s9, %s3921_s9   ;;  %s2932_s5 = sphi %s3090_s5, %s3920_s5   ;;  %s2928_s8 = sphi %s3088_s8, %s3919_s8  }
  0x15   : > { %3882 = sst [smem:[#allocation6_spill]] %s2932_s5  ;;  %s2597_s6 = sadd.s32 4294967294, %s2940_s30  }
  0x16   : > { %3883 = sst [smem:[#allocation7_spill]] %s2936_s9  ;;  %s3113_s10 = sadd.s32 1, %s2940_s30  }
  0x17   : > { %3884 = sst [smem:[#allocation8_spill]] %s2940_s30  ;;  %s646_s0 = sadd.s32 1, %s2936_s9 }
  0x18   : > { %3885 = sst [smem:[#allocation9_spill]] %s3109_s3  ;;  %s643_s11 = ssub.s32 %s2940_s30, %s3113_s10 }
  0x19   : > { %3886 = sst [smem:[#allocation10_spill]] %s3113_s10  ;;  %p656_p0 = scmp.ne.s32.totalorder %s2936_s9, %s2932_s5 }
  0x1a   : > { %p644_p1 = scmp.eq.s32.totalorder %s643_s11, 0  ;;  %p657_p2 = scmp.eq.s32.totalorder %s3109_s3, 1 }
  0x1b   : > { %p662_p3 = scmp.ne.s32.totalorder %s2932_s5, %s2928_s8  ;;  %p663_p4 = scmp.eq.s32.totalorder %s2597_s6, 1 }
  0x1c   : > { %s3124_s29 = scalar_select %p644_p1, %s2936_s9, %s646_s0  }
  0x1d   : > { %p3126_p5 = por %p657_p2, %p656_p0  ;;  %p3130_p6 = por %p663_p4, %p662_p3 }
  0x1e   : > { %3887 = sst [smem:[#allocation11_spill]] %s3124_s29  ;;  %p2600_p7 = scmp.ge.s32.totalorder %s2940_s30, 1 }
  0x1f   : > { %s3888_s2 = scalar_select %p3126_p5, 1, 0 }
  0x20   : > { %s3890_s7 = scalar_select %p3130_p6, 1, 0 }
  0x21   : > { %3889 = sst [smem:[#allocation12_spill]] %s3888_s2  ;;  %p773_p8 = scmp.lt.s32.totalorder %s2940_s30, 3 }
  0x22   : > { %3891 = sst [smem:[#allocation13_spill]] %s3890_s7 }
  0x23   : > { %p774_p9 = pnand %p2600_p7, %p773_p8 }
  0x24   : > { %p850_p10 = scmp.lt.s32.totalorder (!%p774_p9), %s3109_s3, 1  ;;  %s3892_s0 = sld [smem:[#allocation14_spill]] (!%p774_p9) }
  0x25   : > { %777 = sbr.rel (%p774_p9) target bundleno = 5626 (0x15fa), region = 132  ;;  %s3894_s29 = sld [smem:[#allocation22_spill]] (!%p774_p9) }
  0x26   : > { %s3895_s30 = sld [smem:[#allocation20_spill]] (!%p774_p9) }
  0x27   : > { %s3898_s8 = sld [smem:[#allocation17_spill]] (!%p774_p9) }
  0x28   : > { %s3904_s6 = sld [smem:[#allocation24_spill]] (!%p774_p9) }
  0x29   : > { %s3905_s10 = sld [smem:[#allocation25_spill]] (!%p774_p9) }
  0x2a   : > { %s3138_s12 = scalar_select %p850_p10, %s3109_s3, 1  ;;  %vm862_vm0 = vcmask 261120   ;;  %v2942_v2 = vmov 32.0   ;;  %vm993_vm5 = vcmask 64512  }
  0x2b   : > { %2836 = vrcp.f32 %v2942_v2  ;;  %v968_v15 = vld [vmem:[%s3894_s29 + $0x18] sm:$0xff]  ;;  %v967_v17 = vld [vmem:[%s3894_s29 + $0x10] sm:$0xff]  ;;  %v966_v19 = vld [vmem:[%s3894_s29 + $0x8] sm:$0xff]  ;;  %s3907_s5 = sld [smem:[#allocation15_spill]] }
  0x2c   : > { %s3848_s1 = sshll.u32 %s3138_s12, 3  ;;  %985 = vmatpush.msra.mxu2 %v968_v15  ;;  %v965_v21 = vld [vmem:[%s3894_s29] sm:$0xff]  ;;  %s3896_s2 = smov %s3895_s30  ;;  %v940_v22 = vld [vmem:[%s3895_s30 + $0x18] sm:$0xff]  ;;  %v2624_v48 = vld [vmem:[%s3894_s29 + $0x30] sm:$0xff] }
  0x2d   : > { %s853_s11 = scalar_lea.vmem %s3892_s0, %s3848_s1  ;;  %s3893_s0 = sld [smem:[#allocation18_spill]]  ;;  %v939_v24 = vld [vmem:[%s3896_s2 + $0x10] sm:$0xff]  ;;  %v938_v26 = vld [vmem:[%s3896_s2 + $0x8] sm:$0xff]  ;;  %v937_v30 = vld [vmem:[%s3896_s2] sm:$0xff] }
  0x2e   : > { %v3146_v0 = vld [vmem:[%s853_s11] sm:$0xff]  ;;  %986 = vmatpush.msra.mxu2 %v967_v17  ;;  %s3897_s11 = sld [smem:[#allocation16_spill]]  ;;  %v2619_v45 = vld [vmem:[%s3896_s2 + $0x38] sm:$0xff]  ;;  %v2618_v47 = vld [vmem:[%s3896_s2 + $0x30] sm:$0xff]  ;;  %s3906_s27 = sshll.u32 %s3138_s12, 3 }
  0x2f   : > { %v863_v1 = vsel %vm862_vm0, %v3146_v0, 0.0  ;;  %v2803_v41 = vld [vmem:[%s3898_s8] ss:$0 sm:$0xff]  ;;  %v2625_v46 = vld [vmem:[%s3894_s29 + $0x38] sm:$0xff]  ;;  %v2617_v49 = vld [vmem:[%s3896_s2 + $0x28] sm:$0xff]  ;;  %s3900_s8 = sld [smem:[#allocation21_spill]] }
  0x30   : > { %864 = vadd.xlane.f32.xlu0 %v863_v1  ;;  %987 = vmatpush.msra.mxu2 %v966_v19  ;;  %v2623_v50 = vld [vmem:[%s3894_s29 + $0x28] sm:$0xff]  ;;  %v2616_v51 = vld [vmem:[%s3896_s2 + $0x20] sm:$0xff]  ;;  %s3902_s30 = sld [smem:[#allocation23_spill]] }
  0x31   : > { %v2837_v3 = vpop.eup %2836  ;;  %v2622_v52 = vld [vmem:[%s3894_s29 + $0x20] sm:$0xff]  ;;  %s3909_s25 = sld [smem:[#allocation27_spill]] }
  0x32   : > { %v867_v4 = vmul.f32 32.0, %v2837_v3  ;;  %vm871_vm1 = vweird.f32 %v2837_v3  ;;  %988 = vmatpush.msra.mxu2 %v965_v21  ;;  %s3911_s1 = sld [smem:[#allocation9_spill]] }
  0x33   : > { %v908_v14 = vld [vmem:[%s3893_s0 + $0x18] sm:$0xff]  ;;  %v907_v16 = vld [vmem:[%s3893_s0 + $0x10] sm:$0xff]  ;;  %v906_v18 = vld [vmem:[%s3893_s0 + $0x8] sm:$0xff] }
  0x34   : > { %v868_v5 = vsub.f32 1.0, %v867_v4  ;;  %928 = vmatpush.msra.mxu1 %v908_v14  ;;  %v905_v20 = vld [vmem:[%s3893_s0] sm:$0xff]  ;;  %v2613_v23 = vld [vmem:[%s3893_s0 + $0x38] sm:$0xff]  ;;  %v2612_v25 = vld [vmem:[%s3893_s0 + $0x30] sm:$0xff] }
  0x35   : > { %1078 = vmatpush.msrb.mxu2 %v2613_v23  ;;  %v2611_v27 = vld [vmem:[%s3893_s0 + $0x28] sm:$0xff]  ;;  %v2610_v31 = vld [vmem:[%s3893_s0 + $0x20] sm:$0xff]  ;;  %s3901_s7 = smov %s3900_s8  ;;  %v2637_v23 = vld [vmem:[%s3893_s0 + $0x58] sm:$0xff] }
  0x36   : > { %v869_v6 = vmul.f32 %v2837_v3, %v868_v5  ;;  %929 = vmatpush.msra.mxu1 %v907_v16  ;;  %v2802_v39 = vld [vmem:[%s3897_s11] ss:$0 sm:$0xff]  ;;  %s3899_s11 = sld [smem:[#allocation19_spill]]  ;;  %s3903_s4 = smov %s3902_s30  ;;  %v2808_v63 = vld [vmem:[%s3901_s7 + $0x1] ss:$0 sm:$0xff] }
  0x37   : > { %1079 = vmatpush.msrb.mxu2 %v2612_v25  ;;  %v2806_v55 = vld [vmem:[%s3900_s8] ss:$0 sm:$0xff]  ;;  %v2809_v4 = vld [vmem:[%s3903_s4 + $0x1] ss:$0 sm:$0xff] }
  0x38   : > { %v870_v7 = vadd.f32 %v2837_v3, %v869_v6  ;;  %930 = vmatpush.msra.mxu1 %v906_v18  ;;  %v2805_v56 = vld [vmem:[%s3902_s30] ss:$0 sm:$0xff]  ;;  %s857_s30 = scalar_lea.vmem %s3907_s5, %s3906_s27  ;;  %s2759_s8 = sshll.u32 %s3911_s1, 3 }
  0x39   : > { %1080 = vmatpush.msrb.mxu2 %v2611_v27  ;;  %v2634_v27 = vld [vmem:[%s3893_s0 + $0x40] sm:$0xff]  ;;  %s3912_s27 = sld [smem:[#allocation28_spill]] }
  0x3a   : > { %v3150_v8 = vsel %vm871_vm1, %v2837_v3, %v870_v7  ;;  %931 = vmatpush.msra.mxu1 %v905_v20  ;;  %v900_v7 = vlaneseq }
  0x3b   : > { %1081 = vmatpush.msrb.mxu2 %v2610_v31 }
  0x3c   : > { %957 = vmatpush.msrb.mxu1 %v940_v22  ;;  %v2804_v54 = vld [vmem:[%s3899_s11] ss:$0 sm:$0xff]  ;;  %v2807_v21 = vld [vmem:[%s3899_s11 + $0x1] ss:$0 sm:$0xff] }
  0x3e   : > { %958 = vmatpush.msrb.mxu1 %v939_v24  ;;  %v2636_v24 = vld [vmem:[%s3893_s0 + $0x50] sm:$0xff] }
  0x40   : > { %959 = vmatpush.msrb.mxu1 %v938_v26  ;;  %v2635_v26 = vld [vmem:[%s3893_s0 + $0x48] sm:$0xff] }
  0x42   : > { %960 = vmatpush.msrb.mxu1 %v937_v30 }
  0xa3   : > { %v865_v9 = vpop.xlane.xlu0 %864 }
  0xa4   : > { %v873_v10 = vmul.f32 %v3150_v8, %v865_v9  ;;  %v3266_v9 = vshrl.u32 %v900_v7, 7 }
  0xa6   : > { %v874_v11 = vsub.f32 %v3146_v0, %v873_v10  ;;  %v3268_v10 = vand.u32 127, %v900_v7 }
  0xa8   : > { %v875_v12 = vmul.f32 %v874_v11, %v874_v11  ;;  %vm904_vm6 = vcmp.ge.s32.totalorder %v3266_v9, %v3268_v10 }
  0xaa   : > { %v876_v13 = vsel %vm862_vm0, %v875_v12, 0.0 }
  0xab   : > { %877 = vadd.xlane.f32.xlu0 %v876_v13 }
 0x11e   : > { %v878_v28 = vpop.xlane.xlu0 %877 }
 0x11f   : > { %v879_v29 = vmul.f32 %v878_v28, %v3150_v8 }
 0x121   : > { %v880_v32 = vadd.f32 1e-05, %v879_v29  ;;  %v1055_v29 = vld [vmem:[%s3904_s6] sm:$0xff] }
 0x123   : > { %2838 = vrsqrt.f32 %v880_v32  ;;  %vm887_vm3 = vweird.f32 %v880_v32 }
 0x129   : > { %v2839_v33 = vpop.eup %2838 }
 0x12a   : > { %v882_v34 = vmul.f32 %v2839_v33, %v880_v32  ;;  %vm888_vm2 = vweird.f32 %v2839_v33 }
 0x12b   : > { %vm889_vm4 = vmor %vm887_vm3, %vm888_vm2 }
 0x12c   : > { %v883_v35 = vmul.f32 %v2839_v33, %v882_v34 }
 0x12e   : > { %v884_v36 = vmul.f32 0.5, %v883_v35 }
 0x130   : > { %v885_v37 = vsub.f32 1.5, %v884_v36 }
 0x132   : > { %v886_v38 = vmul.f32 %v2839_v33, %v885_v37 }
 0x134   : > { %v890_v40 = vsel %vm889_vm4, %v2839_v33, %v886_v38 }
 0x135   : > { %v891_v42 = vmul.f32 %v890_v40, %v874_v11  ;;  %v2642_v40 = vld [vmem:[%s3896_s2 + $0x50] sm:$0xff] }
 0x137   : > { %v895_v43 = vmul.f32 %v2802_v39, %v891_v42  ;;  %v2643_v39 = vld [vmem:[%s3896_s2 + $0x58] sm:$0xff]  ;;  %v2640_v42 = vld [vmem:[%s3896_s2 + $0x40] sm:$0xff] }
 0x139   : > { %v3210_v44 = vadd.f32 %v2803_v41, %v895_v43  ;;  %v2641_v41 = vld [vmem:[%s3896_s2 + $0x48] sm:$0xff] }
 0x13b   : > { %2604 = vmatmul.msk.f32.vlgmr.msra.gmra.mxu1 %vm862_vm0, %v3210_v44  ;;  %2606 = vmatmul.msk.f32.vlgmr.msra.gmra.mxu2 %vm862_vm0, %v3210_v44 }
 0x13c   : > { %1109 = vmatpush.msra.mxu1 %v2619_v45  ;;  %1139 = vmatpush.msra.mxu2 %v2625_v46 }
 0x13e   : > { %1110 = vmatpush.msra.mxu1 %v2618_v47  ;;  %1140 = vmatpush.msra.mxu2 %v2624_v48  ;;  %v2631_v47 = vld [vmem:[%s3904_s6 + $0x8] sm:$0xff]  ;;  %v2649_v48 = vld [vmem:[%s3894_s29 + $0x58] sm:$0xff] }
 0x140   : > { %1111 = vmatpush.msra.mxu1 %v2617_v49  ;;  %1141 = vmatpush.msra.mxu2 %v2623_v50  ;;  %v2648_v49 = vld [vmem:[%s3894_s29 + $0x50] sm:$0xff]  ;;  %v2647_v50 = vld [vmem:[%s3894_s29 + $0x48] sm:$0xff] }
 0x142   : > { %1112 = vmatpush.msra.mxu1 %v2616_v51  ;;  %1142 = vmatpush.msra.mxu2 %v2622_v52  ;;  %v2646_v51 = vld [vmem:[%s3894_s29 + $0x40] sm:$0xff]  ;;  %v2660_v52 = vld [vmem:[%s3893_s0 + $0x78] sm:$0xff] }
 0x143   : > { %2605 = vmatmul.msk.f32.vlgmr.msrb.gmra.mxu1 %vm862_vm0, %v3210_v44  ;;  %2615 = vmatmul.msk.f32.vlgmr.msrb.gmra.mxu2 %vm862_vm0, %v3210_v44 }
 0x144   : > { %1251 = vmatpush.msrb.mxu2 %v1055_v29  ;;  %1228 = vmatpush.msrb.mxu1 %v2631_v47  ;;  %v2669_v29 = vld [vmem:[%s3894_s29 + $0x60] sm:$0xff] }
 0x14b   : > { %2621 = vmatmul.msk.f32.vlgmr.msra.gmra.mxu1 %vm862_vm0, %v3210_v44  ;;  %2627 = vmatmul.msk.f32.vlgmr.msra.gmra.mxu2 %vm862_vm0, %v3210_v44 }
 0x14c   : > { %1339 = vmatpush.msra.mxu1 %v2649_v48 }
 0x14e   : > { %1340 = vmatpush.msra.mxu1 %v2648_v49 }
 0x150   : > { %1341 = vmatpush.msra.mxu1 %v2647_v50 }
 0x152   : > { %1342 = vmatpush.msra.mxu1 %v2646_v51  ;;  %v2678_v51 = vld [vmem:[%s3904_s6 + $0x18] sm:$0xff] }
 0x1b8   : > { %v933_v53 = vpop.f32.mrf.mxu1 }
 0x1b9   : > { %v934_v58 = vadd.f32 %v2804_v54, %v933_v53  ;;  %v2659_v54 = vld [vmem:[%s3893_s0 + $0x70] sm:$0xff] }
 0x1bb   : > { %v936_v62 = vmul.f32 0.35355338, %v934_v58  ;;  %v2811_v58 = vld [vmem:[%s3901_s7 + $0x2] ss:$0 sm:$0xff] }
 0x1be   : > { %v990_v57 = vpop.f32.mrf.mxu2 }
 0x1bf   : > { %v991_v61 = vadd.f32 %v2805_v56, %v990_v57  ;;  %v2810_v56 = vld [vmem:[%s3899_s11 + $0x2] ss:$0 sm:$0xff] }
 0x1c0   : > { %v962_v59 = vpop.f32.mrf.mxu1 }
 0x1c1   : > { %v963_v60 = vadd.f32 %v2806_v55, %v962_v59  ;;  %v2658_v55 = vld [vmem:[%s3893_s0 + $0x68] sm:$0xff]  ;;  %v2657_v59 = vld [vmem:[%s3893_s0 + $0x60] sm:$0xff]  ;;  %s3913_s0 = sld [smem:[#allocation29_spill]] }
 0x1c3   : > { %2607 = vmatpush.xpose.msk.msra.mxu3 %vm993_vm5, %v963_v60 }
 0x1c6   : > { %2608 = vmatmul.msk.f32.vlgmr.msra.gmra.mxu3 %vm993_vm5, %v936_v62  ;;  %v1083_v1 = vpop.f32.mrf.mxu2 }
 0x1c7   : > { %1050 = vmatpush.msrb.mxu3 %v991_v61  ;;  %v1084_v25 = vadd.f32 %v2807_v21, %v1083_v1 }
 0x1c8   : > { %v1114_v2 = vpop.f32.mrf.mxu1 }
 0x1c9   : > { %v1115_v3 = vadd.f32 %v2808_v63, %v1114_v2  ;;  %v1086_v28 = vmul.f32 0.35355338, %v1084_v25  ;;  %v2666_v63 = vld [vmem:[%s3896_s2 + $0x78] sm:$0xff]  ;;  %v2665_v2 = vld [vmem:[%s3896_s2 + $0x70] sm:$0xff] }
 0x1cb   : > { %2628 = vmatpush.xpose.msk.msra.mxu3 %vm993_vm5, %v1115_v3  ;;  %v2664_v3 = vld [vmem:[%s3896_s2 + $0x68] sm:$0xff] }
 0x1ce   : > { %v1144_v5 = vpop.f32.mrf.mxu2 }
 0x1cf   : > { %v1145_v6 = vadd.f32 %v2809_v4, %v1144_v5  ;;  %v2663_v4 = vld [vmem:[%s3896_s2 + $0x60] sm:$0xff]  ;;  %v2655_v5 = vld [vmem:[%s3904_s6 + $0x10] sm:$0xff]  ;;  %s2521_s2 = scalar_lea.hbm %s3913_s0, %s2759_s8 }
 0x1d1   : > { %1203 = vmatpush.msra.mxu0 %v1145_v6 }
 0x1d3   : > { %1309 = vmatpush.msrb.mxu0 %v2643_v39 }
 0x1d5   : > { %1310 = vmatpush.msrb.mxu0 %v2642_v40 }
 0x1d7   : > { %1311 = vmatpush.msrb.mxu0 %v2641_v41 }
 0x1d9   : > { %1312 = vmatpush.msrb.mxu0 %v2640_v42 }
 0x249   : > { %v1017_v11 = vpop.f32.mrf.mxu3 }
 0x24a   : > { %v1020_v12 = vsel %vm904_vm6, %v1017_v11, -inf }
 0x24b   : > { %v1021_v13 = vsel %vm993_vm5, %v1020_v12, -inf }
 0x24c   : > { %1022 = vmax.xlane.f32.xlu1 %v1021_v13 }
 0x2bf   : > { %v1023_v14 = vpop.xlane.xlu1 %1022 }
 0x2c0   : > { %v1024_v15 = vsub.f32 %v1020_v12, %v1023_v14  ;;  %v2812_v12 = vld [vmem:[%s3903_s4 + $0x2] ss:$0 sm:$0xff] }
 0x2c2   : > { %v1025_v16 = vmul.f32 1.442695, %v1024_v15 }
 0x2c4   : > { %2840 = vpow2.f32 %v1025_v16 }
 0x2ca   : > { %v2841_v17 = vpop.eup %2840 }
 0x2cb   : > { %v1027_v18 = vsel %vm993_vm5, %v2841_v17, 0.0 }
 0x2cc   : > { %1028 = vadd.xlane.f32.xlu1 %v1027_v18  ;;  %v2814_v18 = vld [vmem:[%s3901_s7 + $0x3] ss:$0 sm:$0xff]  ;;  %s2525_s7 = sshll.u32 %s2521_s2, 4  ;;  %s2526_s7 = int_to_ptr.hbm [resolvable:$true] %s2525_s7 }
 0x2cd   : > { %s2892_s1 = sshra.s32 %s2526_s7, 4  ;;  %s2893_s1 = int_to_ptr.hbm [resolvable:$true] %s2892_s1 }
 0x2ce   : > { %s2894_s3 = scalar_lea.hbm %s2893_s1, 8  ;;  %p2899_p0 = scmp.lt.s32.totalorder %s2893_s1, %s3913_s0 }
 0x2cf   : > { %p2895_p11 = scmp.ne.s32.totalorder %s2893_s1, %s2894_s3 }
 0x2d1   : > { %p2896_p12 = pnand %p2895_p11, %p3126_p5 }
 0x2d3   : > { %p2897_p13 = pneg %p2896_p12 }
 0x33f   : > { %v1029_v19 = vpop.xlane.xlu1 %1028 }
 0x340   : > { %2842 = vrcp.f32 %v1029_v19 }
 0x346   : > { %v2843_v20 = vpop.eup %2842 }
 0x347   : > { %v1031_v22 = vmul.f32 %v2843_v20, %v2841_v17 }
 0x349   : > { %2609 = vmatmul.msk.f32.vlgmr.msrb.gmra.mxu3 %vm993_vm5, %v1031_v22 }
 0x34a   : > { %1278 = vmatpush.msrb.mxu3 %v2637_v23 }
 0x34c   : > { %1279 = vmatpush.msrb.mxu3 %v2636_v24 }
 0x34e   : > { %1280 = vmatpush.msrb.mxu3 %v2635_v26  ;;  %v2672_v26 = vld [vmem:[%s3894_s29 + $0x78] sm:$0xff] }
 0x350   : > { %1281 = vmatpush.msrb.mxu3 %v2634_v27  ;;  %v2671_v27 = vld [vmem:[%s3894_s29 + $0x70] sm:$0xff] }
 0x351   : > { %2629 = vmatmul.msk.f32.vlgmr.msra.gmra.mxu3 %vm993_vm5, %v1086_v28  ;;  %v2670_v28 = vld [vmem:[%s3894_s29 + $0x68] sm:$0xff] }
 0x359   : > { %2639 = vmatmul.msk.f32.vlgmr.msrb.gmra.mxu3 %vm862_vm0, %v3210_v44 }
 0x3cc   : > { %v1052_v30 = vpop.f32.mrf.mxu3 }
 0x3cd   : > { %2633 = vmatmul.msk.f32.vlgmr.msrb.gmra.mxu2 %vm993_vm5, %v1052_v30 }
 0x3d4   : > { %v1170_v31 = vpop.f32.mrf.mxu3 }
 0x3d5   : > { %v1173_v32 = vsel %vm904_vm6, %v1170_v31, -inf }
 0x3d6   : > { %v1174_v33 = vsel %vm993_vm5, %v1173_v32, -inf }
 0x3d7   : > { %1175 = vmax.xlane.f32.xlu2 %v1174_v33  ;;  %v2813_v33 = vld [vmem:[%s3899_s11 + $0x3] ss:$0 sm:$0xff] }
 0x3dc   : > { %v1283_v57 = vpop.f32.mrf.mxu3 }
 0x3dd   : > { %v1284_v60 = vadd.f32 %v2810_v56, %v1283_v57 }
 0x3df   : > { %v1286_v1 = vmul.f32 0.35355338, %v1284_v60 }
 0x44a   : > { %v1176_v34 = vpop.xlane.xlu2 %1175 }
 0x44b   : > { %v1177_v35 = vsub.f32 %v1173_v32, %v1176_v34 }
 0x44d   : > { %v1178_v36 = vmul.f32 1.442695, %v1177_v35 }
 0x44f   : > { %2844 = vpow2.f32 %v1178_v36 }
 0x450   : > { %v1253_v6 = vpop.f32.mrf.mxu2 }
 0x455   : > { %v2845_v37 = vpop.eup %2844 }
 0x456   : > { %v1180_v38 = vsel %vm993_vm5, %v2845_v37, 0.0 }
 0x457   : > { %1181 = vadd.xlane.f32.xlu2 %v1180_v38 }
 0x4ca   : > { %v1182_v43 = vpop.xlane.xlu2 %1181 }
 0x4cb   : > { %2846 = vrcp.f32 %v1182_v43 }
 0x4d1   : > { %v2847_v45 = vpop.eup %2846 }
 0x4d2   : > { %v1184_v46 = vmul.f32 %v2847_v45, %v2845_v37  ;;  %v2815_v37 = vld [vmem:[%s3903_s4 + $0x3] ss:$0 sm:$0xff] }
 0x4d4   : > { %2630 = vmatmul.msk.f32.vlgmr.msra.gmra.mxu0 %vm993_vm5, %v1184_v46 }
 0x4d5   : > { %1428 = vmatpush.msra.mxu0 %v2655_v5  ;;  %v1682_v5 = vld [vmem:[%s3828_s16] sm:$0xff] }
 0x4dc   : > { %2645 = vmatmul.msk.f32.vlgmr.msrb.gmra.mxu0 %vm862_vm0, %v3210_v44 }
 0x551   : > { %v1205_v53 = vpop.f32.mrf.mxu0 }
 0x552   : > { %2632 = vmatmul.msk.f32.vlgmr.msrb.gmra.mxu1 %vm993_vm5, %v1205_v53 }
 0x553   : > { %1456 = vmatpush.msrb.mxu1 %v2660_v52 }
 0x555   : > { %1457 = vmatpush.msrb.mxu1 %v2659_v54  ;;  %v2816_v54 = vld [vmem:[%s3905_s10] ss:$0 sm:$0xff] }
 0x557   : > { %1458 = vmatpush.msrb.mxu1 %v2658_v55 }
 0x559   : > { %v1314_v61 = vpop.f32.mrf.mxu0  ;;  %1459 = vmatpush.msrb.mxu1 %v2657_v59 }
 0x55a   : > { %v1315_v62 = vadd.f32 %v2811_v58, %v1314_v61  ;;  %2651 = vmatmul.msk.f32.vlgmr.msra.gmra.mxu1 %vm862_vm0, %v3210_v44 }
 0x55c   : > { %2652 = vmatpush.xpose.msk.msra.mxu2 %vm993_vm5, %v1315_v62 }
 0x55f   : > { %2653 = vmatmul.msk.f32.vlgmr.msra.gmra.mxu2 %vm993_vm5, %v1286_v1 }
 0x560   : > { %1487 = vmatpush.msrb.mxu2 %v2666_v63 }
 0x562   : > { %1488 = vmatpush.msrb.mxu2 %v2665_v2  ;;  %2662 = vmatmul.msk.f32.vlgmr.msrb.gmra.mxu1 %vm862_vm0, %v3210_v44  ;;  %v1685_v2 = vld [vmem:[%s3828_s16 + $0x18] sm:$0xff] }
 0x564   : > { %1489 = vmatpush.msrb.mxu2 %v2664_v3  ;;  %v1683_v3 = vld [vmem:[%s3828_s16 + $0x8] sm:$0xff] }
 0x566   : > { %1490 = vmatpush.msrb.mxu2 %v2663_v4  ;;  %v3447_v4 = vld [vmem:[%s857_s30] sm:$0xff]  ;;  %s3908_s30 = sld [smem:[#allocation26_spill]] }
 0x567   : > { %2668 = vmatmul.msk.f32.vlgmr.msrb.gmra.mxu2 %vm862_vm0, %v3210_v44 }
 0x568   : > { %1606 = vmatpush.msra.mxu2 %v2678_v51 }
 0x5cf   : > { %v1230_v7 = vpop.f32.mrf.mxu1 }
 0x5d0   : > { %v1254_v11 = vadd.f32 %v1253_v6, %v1230_v7  ;;  %v1653_v6 = vld [vmem:[%s3826_s14 + $0x18] sm:$0xff] }
 0x5d1   : > { %v2689_v7 = vld [vmem:[%s3826_s14 + $0x38] sm:$0xff] }
 0x5d7   : > { %v1344_v13 = vpop.f32.mrf.mxu1 }
 0x5d8   : > { %v1345_v14 = vadd.f32 %v2812_v12, %v1344_v13  ;;  %v2688_v12 = vld [vmem:[%s3826_s14 + $0x30] sm:$0xff]  ;;  %v1651_v13 = vld [vmem:[%s3826_s14 + $0x8] sm:$0xff] }
 0x5da   : > { %1403 = vmatpush.msra.mxu3 %v1345_v14  ;;  %v2687_v14 = vld [vmem:[%s3826_s14 + $0x28] sm:$0xff] }
 0x5dc   : > { %1517 = vmatpush.msrb.mxu3 %v2672_v26  ;;  %v2817_v26 = vld [vmem:[%s3908_s30] ss:$0 sm:$0xff]  ;;  %s3910_s30 = sld [smem:[#allocation6_spill]] }
 0x5de   : > { %1518 = vmatpush.msrb.mxu3 %v2671_v27 }
 0x5df   : > { %v1461_v34 = vpop.f32.mrf.mxu1 }
 0x5e0   : > { %1519 = vmatpush.msrb.mxu3 %v2670_v28  ;;  %v1462_v36 = vadd.f32 %v2813_v33, %v1461_v34 }
 0x5e2   : > { %v1370_v15 = vpop.f32.mrf.mxu2  ;;  %1520 = vmatpush.msrb.mxu3 %v2669_v29  ;;  %v1464_v38 = vmul.f32 0.35355338, %v1462_v36  ;;  %v2818_v29 = vld [vmem:[%s3825_s13] ss:$0 sm:$0xff]  ;;  %s847_s9 = sand.u32 1, %s3910_s30  }
 0x5e3   : > { %v1373_v16 = vsel %vm904_vm6, %v1370_v15, -inf  ;;  %v1650_v15 = vld [vmem:[%s3826_s14] sm:$0xff]  ;;  %s2601_s10 = sshll.u32 %s847_s9, 3  ;;  %s2511_s30 = scalar_lea.sflag [#allocation3], %s847_s9 }
 0x5e4   : > { %v1374_v17 = vsel %vm993_vm5, %v1373_v16, -inf  ;;  %s849_s4 = scalar_lea.vmem [#allocation2], %s2601_s10  ;;  %s2898_s10 = scalar_lea.hbm %s3913_s0, 16 }
 0x5e5   : > { %1375 = vmax.xlane.f32.xlu0 %v1374_v17  ;;  %s2523_s6 = sshll.u32 %s849_s4, 4  ;;  %p2900_p1 = scmp.lt.s32.totalorder %s2898_s10, %s2894_s3  ;;  %s2524_s6 = int_to_ptr.vmem [resolvable:$true] %s2523_s6 }
 0x5e7   : > { %p2901_p2 = por %p2900_p1, %p2899_p0 }
 0x5e9   : > { %p2902_p3 = pnand %p2901_p2, %p2897_p13 }
 0x5ea   : > { %v1492_v19 = vpop.f32.mrf.mxu2 }
 0x5eb   : > { %v1493_v20 = vadd.f32 %v2814_v18, %v1492_v19 }
 0x5ed   : > { %2675 = vmatpush.xpose.msk.msrb.mxu0 %vm993_vm5, %v1493_v20 }
 0x658   : > { %v1376_v21 = vpop.xlane.xlu0 %1375 }
 0x659   : > { %v1377_v22 = vsub.f32 %v1373_v16, %v1376_v21  ;;  %v2686_v16 = vld [vmem:[%s3826_s14 + $0x20] sm:$0xff] }
 0x65b   : > { %v1378_v23 = vmul.f32 1.442695, %v1377_v22 }
 0x65d   : > { %2848 = vpow2.f32 %v1378_v23 }
 0x663   : > { %v2849_v24 = vpop.eup %2848 }
 0x664   : > { %v1380_v25 = vsel %vm993_vm5, %v2849_v24, 0.0 }
 0x665   : > { %1381 = vadd.xlane.f32.xlu1 %v1380_v25 }
 0x6d8   : > { %v1382_v30 = vpop.xlane.xlu1 %1381 }
 0x6d9   : > { %2850 = vrcp.f32 %v1382_v30 }
 0x6df   : > { %v2851_v31 = vpop.eup %2850 }
 0x6e0   : > { %v1384_v32 = vmul.f32 %v2851_v31, %v2849_v24 }
 0x6e2   : > { %2654 = vmatmul.msk.f32.vlgmr.msra.gmra.mxu3 %vm993_vm5, %v1384_v32  ;;  %v2819_v32 = vld [vmem:[%s3829_s17] ss:$0 sm:$0xff] }
 0x6e3   : > { %1673 = vmatpush.msra.mxu3 %v1653_v6  ;;  %v2712_v6 = vld [vmem:[%s3826_s14 + $0x50] sm:$0xff] }
 0x6ea   : > { %2674 = vmatmul.msk.f32.vlgmr.msrb.gmra.mxu3 %vm862_vm0, %v3210_v44 }
 0x765   : > { %v1405_v35 = vpop.f32.mrf.mxu3 }
 0x766   : > { %2656 = vmatmul.msk.f32.vlgmr.msra.gmra.mxu0 %vm993_vm5, %v1405_v35  ;;  %v2821_v35 = vld [vmem:[%s3827_s15] ss:$0 sm:$0xff] }
 0x767   : > { %1705 = vmatpush.msra.mxu0 %v1685_v2  ;;  %v2820_v2 = vld [vmem:[%s3827_s15 + $0x1] ss:$0 sm:$0xff] }
 0x76d   : > { %v1522_v39 = vpop.f32.mrf.mxu3 }
 0x76e   : > { %v1523_v40 = vadd.f32 %v2815_v37, %v1522_v39  ;;  %2676 = vmatmul.msk.f32.vlgmr.msrb.gmra.mxu0 %vm993_vm5, %v1464_v38  ;;  %v1716_v39 = vld [vmem:[%s3830_s18 + $0x18] sm:$0xff] }
 0x770   : > { %1581 = vmatpush.msra.mxu1 %v1523_v40 }
 0x772   : > { %1733 = vmatpush.msrb.mxu1 %v1716_v39  ;;  %v2736_v39 = vld [vmem:[%s3826_s14 + $0x78] sm:$0xff] }
 0x7e3   : > { %v1430_v44 = vpop.f32.mrf.mxu0 }
 0x7e4   : > { %v1433_v41 = vadd.f32 %v1430_v44, %v1254_v11  ;;  %v1652_v11 = vld [vmem:[%s3826_s14 + $0x10] sm:$0xff] }
 0x7e5   : > { %1674 = vmatpush.msra.mxu3 %v1652_v11  ;;  %v2711_v11 = vld [vmem:[%s3826_s14 + $0x48] sm:$0xff] }
 0x7e7   : > { %1675 = vmatpush.msra.mxu3 %v1651_v13 }
 0x7e9   : > { %1676 = vmatpush.msra.mxu3 %v1650_v15  ;;  %v2825_v15 = vld [vmem:[%s3831_s19 + $0x1] ss:$0 sm:$0xff] }
 0x7eb   : > { %v1548_v42 = vpop.f32.mrf.mxu0 }
 0x7ec   : > { %v1551_v43 = vsel %vm904_vm6, %v1548_v42, -inf  ;;  %v1714_v42 = vld [vmem:[%s3830_s18 + $0x8] sm:$0xff] }
 0x7ed   : > { %v1552_v45 = vsel %vm993_vm5, %v1551_v43, -inf }
 0x7ee   : > { %1553 = vmax.xlane.f32.xlu2 %v1552_v45  ;;  %v2695_v45 = vld [vmem:[%s3828_s16 + $0x38] sm:$0xff] }
 0x861   : > { %v1554_v46 = vpop.xlane.xlu2 %1553 }
 0x862   : > { %v1555_v47 = vsub.f32 %v1551_v43, %v1554_v46  ;;  %v1713_v43 = vld [vmem:[%s3830_s18] sm:$0xff]  ;;  %v2694_v46 = vld [vmem:[%s3828_s16 + $0x30] sm:$0xff] }
 0x864   : > { %v1556_v48 = vmul.f32 1.442695, %v1555_v47  ;;  %v2693_v47 = vld [vmem:[%s3828_s16 + $0x28] sm:$0xff] }
 0x866   : > { %2852 = vpow2.f32 %v1556_v48  ;;  %v2692_v48 = vld [vmem:[%s3828_s16 + $0x20] sm:$0xff] }
 0x86c   : > { %v2853_v49 = vpop.eup %2852 }
 0x86d   : > { %v1558_v50 = vsel %vm993_vm5, %v2853_v49, 0.0 }
 0x86e   : > { %1559 = vadd.xlane.f32.xlu0 %v1558_v50 }
 0x8e1   : > { %v1560_v52 = vpop.xlane.xlu0 %1559 }
 0x8e2   : > { %2854 = vrcp.f32 %v1560_v52 }
 0x8e8   : > { %v2855_v9 = vpop.eup %2854 }
 0x8e9   : > { %v1562_v10 = vmul.f32 %v2855_v9, %v2853_v49 }
 0x8eb   : > { %2677 = vmatmul.msk.f32.vlgmr.msra.gmra.mxu1 %vm993_vm5, %v1562_v10  ;;  %v2822_v10 = vld [vmem:[%s3831_s19] ss:$0 sm:$0xff] }
 0x968   : > { %v1583_v53 = vpop.f32.mrf.mxu1 }
 0x969   : > { %2679 = vmatmul.msk.f32.vlgmr.msra.gmra.mxu2 %vm993_vm5, %v1583_v53 }
 0x9ec   : > { %v1608_v55 = vpop.f32.mrf.mxu2 }
 0x9ed   : > { %v1611_v56 = vadd.f32 %v1608_v55, %v1433_v41  ;;  %v1715_v41 = vld [vmem:[%s3830_s18 + $0x10] sm:$0xff]  ;;  %v2823_v55 = vld [vmem:[%s3829_s17 + $0x1] ss:$0 sm:$0xff] }
 0x9ee   : > { %1734 = vmatpush.msrb.mxu1 %v1715_v41  ;;  %v2734_v41 = vld [vmem:[%s3826_s14 + $0x68] sm:$0xff] }
 0x9ef   : > { %v1616_v57 = vadd.f32 %v2816_v54, %v1611_v56 }
 0x9f0   : > { %1735 = vmatpush.msrb.mxu1 %v1714_v42  ;;  %v2824_v42 = vld [vmem:[%s3827_s15 + $0x2] ss:$0 sm:$0xff] }
 0x9f1   : > { %v3426_v58 = vadd.f32 %v1616_v57, %v3146_v0  ;;  %v1684_v0 = vld [vmem:[%s3828_s16 + $0x10] sm:$0xff] }
 0x9f2   : > { %1706 = vmatpush.msra.mxu0 %v1684_v0  ;;  %1736 = vmatpush.msrb.mxu1 %v1713_v43 }
 0x9f3   : > { %v1620_v59 = vsel %vm862_vm0, %v3426_v58, 0.0  ;;  %2682 = vmatmul.msk.f32.vlgmr.msrb.gmra.mxu1 %vm862_vm0, %v3447_v4 }
 0x9f4   : > { %1621 = vadd.xlane.f32.xlu1 %v1620_v59  ;;  %1707 = vmatpush.msra.mxu0 %v1683_v3  ;;  %v2701_v59 = vld [vmem:[%s3830_s18 + $0x38] sm:$0xff] }
 0x9f5   : > { %1855 = vmatpush.msra.mxu1 %v2695_v45  ;;  %v2713_v3 = vld [vmem:[%s3826_s14 + $0x58] sm:$0xff]  ;;  %v2826_v45 = vld [vmem:[%s3829_s17 + $0x2] ss:$0 sm:$0xff] }
 0x9f6   : > { %1708 = vmatpush.msra.mxu0 %v1682_v5 }
 0x9f7   : > { %2681 = vmatmul.msk.f32.vlgmr.msra.gmra.mxu0 %vm862_vm0, %v3447_v4  ;;  %1856 = vmatpush.msra.mxu1 %v2694_v46  ;;  %v2733_v46 = vld [vmem:[%s3826_s14 + $0x60] sm:$0xff] }
 0x9f8   : > { %1824 = vmatpush.msrb.mxu0 %v2689_v7 }
 0x9f9   : > { %1857 = vmatpush.msra.mxu1 %v2693_v47 }
 0x9fa   : > { %1825 = vmatpush.msrb.mxu0 %v2688_v12  ;;  %v2710_v12 = vld [vmem:[%s3826_s14 + $0x40] sm:$0xff] }
 0x9fb   : > { %1858 = vmatpush.msra.mxu1 %v2692_v48 }
 0x9fc   : > { %1826 = vmatpush.msrb.mxu0 %v2687_v14  ;;  %2697 = vmatmul.msk.f32.vlgmr.msra.gmra.mxu1 %vm862_vm0, %v3447_v4  ;;  %v1801_v14 = vld [vmem:[%s3832_s20] sm:$0xff] }
 0x9fe   : > { %1827 = vmatpush.msrb.mxu0 %v2686_v16 }
 0xa67   : > { %v1622_v60 = vpop.xlane.xlu1 %1621 }
 0xa68   : > { %v1623_v61 = vmul.f32 %v1622_v60, %v3150_v8  ;;  %v2700_v60 = vld [vmem:[%s3830_s18 + $0x30] sm:$0xff] }
 0xa6a   : > { %v1624_v62 = vsub.f32 %v3426_v58, %v1623_v61  ;;  %v2699_v61 = vld [vmem:[%s3830_s18 + $0x28] sm:$0xff] }
 0xa6c   : > { %v1625_v63 = vmul.f32 %v1624_v62, %v1624_v62 }
 0xa6e   : > { %v1626_v1 = vsel %vm862_vm0, %v1625_v63, 0.0 }
 0xa6f   : > { %1627 = vadd.xlane.f32.xlu2 %v1626_v1 }
 0xa70   : > { %v1738_v53 = vpop.f32.mrf.mxu1 }
 0xa71   : > { %v1739_v54 = vadd.f32 %v2822_v10, %v1738_v53  ;;  %v2827_v10 = vld [vmem:[%s3831_s19 + $0x2] ss:$0 sm:$0xff] }
 0xa73   : > { %1796 = vmatpush.msrb.mxu3 %v1739_v54 }
 0xa74   : > { %v1710_v33 = vpop.f32.mrf.mxu0 }
 0xa75   : > { %v1711_v34 = vadd.f32 %v2819_v32, %v1710_v33 }
 0xa77   : > { %2683 = vmatpush.xpose.msk.msrb.mxu2 %vm993_vm5, %v1711_v34  ;;  %v2707_v34 = vld [vmem:[%s3832_s20 + $0x8] sm:$0xff] }
 0xa78   : > { %1973 = vmatpush.msrb.mxu1 %v2707_v34  ;;  %v2754_v34 = vld [vmem:[%s3832_s20 + $0x18] sm:$0xff] }
 0xa79   : > { %v1860_v56 = vpop.f32.mrf.mxu1 }
 0xa7a   : > { %v1861_v57 = vadd.f32 %v2823_v55, %v1860_v56 }
 0xa7b   : > { %1885 = vmatpush.msra.mxu2 %v2701_v59 }
 0xa7d   : > { %1886 = vmatpush.msra.mxu2 %v2700_v60 }
 0xa7f   : > { %1887 = vmatpush.msra.mxu2 %v2699_v61 }
 0xae2   : > { %v1628_v17 = vpop.xlane.xlu2 %1627 }
 0xae3   : > { %v1629_v18 = vmul.f32 %v1628_v17, %v3150_v8 }
 0xae5   : > { %v1630_v19 = vadd.f32 1e-05, %v1629_v18 }
 0xae7   : > { %2856 = vrsqrt.f32 %v1630_v19  ;;  %vm1637_vm8 = vweird.f32 %v1630_v19 }
 0xaed   : > { %v2857_v20 = vpop.eup %2856 }
 0xaee   : > { %v1632_v21 = vmul.f32 %v2857_v20, %v1630_v19  ;;  %vm1638_vm7 = vweird.f32 %v2857_v20 }
 0xaef   : > { %vm1639_vm9 = vmor %vm1637_vm8, %vm1638_vm7 }
 0xaf0   : > { %v1633_v22 = vmul.f32 %v2857_v20, %v1632_v21 }
 0xaf2   : > { %v1634_v23 = vmul.f32 0.5, %v1633_v22 }
 0xaf4   : > { %v1635_v24 = vsub.f32 1.5, %v1634_v23 }
 0xaf6   : > { %v1636_v25 = vmul.f32 %v2857_v20, %v1635_v24 }
 0xaf8   : > { %v1640_v27 = vsel %vm1639_vm9, %v2857_v20, %v1636_v25 }
 0xaf9   : > { %v1641_v28 = vmul.f32 %v1640_v27, %v1624_v62  ;;  %v2698_v62 = vld [vmem:[%s3830_s18 + $0x20] sm:$0xff]  ;;  %v2718_v27 = vld [vmem:[%s3828_s16 + $0x50] sm:$0xff] }
 0xafa   : > { %1888 = vmatpush.msra.mxu2 %v2698_v62  ;;  %v2742_v62 = vld [vmem:[%s3828_s16 + $0x78] sm:$0xff] }
 0xafb   : > { %v1645_v30 = vmul.f32 %v2817_v26, %v1641_v28  ;;  %v2719_v26 = vld [vmem:[%s3828_s16 + $0x58] sm:$0xff]  ;;  %v2717_v28 = vld [vmem:[%s3828_s16 + $0x48] sm:$0xff] }
 0xafd   : > { %v3485_v31 = vadd.f32 %v2818_v29, %v1645_v30  ;;  %v2716_v29 = vld [vmem:[%s3828_s16 + $0x40] sm:$0xff] }
 0xaff   : > { %2680 = vmatmul.msk.f32.vlgmr.msra.gmra.mxu3 %vm862_vm0, %v3485_v31  ;;  %2691 = vmatmul.msk.f32.vlgmr.msrb.gmra.mxu0 %vm862_vm0, %v3485_v31 }
 0xb00   : > { %2704 = vmatpush.xpose.msk.msra.mxu3 %vm993_vm5, %v1861_v57 }
 0xb7c   : > { %v1829_v5 = vpop.f32.mrf.mxu0 }
 0xb7d   : > { %v1830_v7 = vadd.f32 %v2820_v2, %v1829_v5  ;;  %v2739_v2 = vld [vmem:[%s3828_s16 + $0x60] sm:$0xff] }
 0xb7f   : > { %v1832_v13 = vmul.f32 0.35355338, %v1830_v7  ;;  %v2829_v7 = vld [vmem:[%s3829_s17 + $0x3] ss:$0 sm:$0xff] }
 0xb82   : > { %v1678_v36 = vpop.f32.mrf.mxu3 }
 0xb83   : > { %v1679_v37 = vadd.f32 %v2821_v35, %v1678_v36  ;;  %v2725_v35 = vld [vmem:[%s3830_s18 + $0x58] sm:$0xff]  ;;  %v2724_v36 = vld [vmem:[%s3830_s18 + $0x50] sm:$0xff] }
 0xb84   : > { %2084 = vmatpush.msra.mxu1 %v2725_v35 }
 0xb85   : > { %v1681_v38 = vmul.f32 0.35355338, %v1679_v37  ;;  %v2723_v37 = vld [vmem:[%s3830_s18 + $0x48] sm:$0xff] }
 0xb86   : > { %2085 = vmatpush.msra.mxu1 %v2724_v36 }
 0xb87   : > { %2684 = vmatmul.msk.f32.vlgmr.msrb.gmra.mxu2 %vm993_vm5, %v1681_v38  ;;  %v2722_v38 = vld [vmem:[%s3830_s18 + $0x40] sm:$0xff] }
 0xb88   : > { %1996 = vmatpush.msrb.mxu2 %v1801_v14  ;;  %2086 = vmatpush.msra.mxu1 %v2723_v37 }
 0xb8a   : > { %2087 = vmatpush.msra.mxu1 %v2722_v38 }
 0xb8f   : > { %2703 = vmatmul.msk.f32.vlgmr.msra.gmra.mxu2 %vm862_vm0, %v3447_v4 }
 0xc0a   : > { %v1764_v40 = vpop.f32.mrf.mxu2 }
 0xc0b   : > { %v1767_v44 = vsel %vm993_vm5, %v1764_v40, -inf }
 0xc0c   : > { %1768 = vmax.xlane.f32.xlu0 %v1767_v44  ;;  %v2735_v44 = vld [vmem:[%s3826_s14 + $0x70] sm:$0xff] }
 0xc12   : > { %v1890_v16 = vpop.f32.mrf.mxu2 }
 0xc13   : > { %v1891_v17 = vadd.f32 %v2825_v15, %v1890_v16 }
 0xc15   : > { %1948 = vmatpush.msra.mxu0 %v1891_v17 }
 0xc17   : > { %2054 = vmatpush.msrb.mxu0 %v2719_v26 }
 0xc19   : > { %2055 = vmatpush.msrb.mxu0 %v2718_v27 }
 0xc1b   : > { %2056 = vmatpush.msrb.mxu0 %v2717_v28 }
 0xc1d   : > { %2057 = vmatpush.msrb.mxu0 %v2716_v29 }
 0xc7f   : > { %v1769_v49 = vpop.xlane.xlu0 %1768 }
 0xc80   : > { %v1770_v50 = vsub.f32 %v1764_v40, %v1769_v49 }
 0xc82   : > { %v1771_v51 = vmul.f32 1.442695, %v1770_v50 }
 0xc84   : > { %2858 = vpow2.f32 %v1771_v51 }
 0xc8a   : > { %v2859_v52 = vpop.eup %2858 }
 0xc8b   : > { %v1773_v9 = vsel %vm993_vm5, %v2859_v52, 0.0 }
 0xc8c   : > { %1774 = vadd.xlane.f32.xlu1 %v1773_v9 }
 0xcff   : > { %v1775_v63 = vpop.xlane.xlu1 %1774 }
 0xd00   : > { %2860 = vrcp.f32 %v1775_v63  ;;  %v2741_v63 = vld [vmem:[%s3828_s16 + $0x70] sm:$0xff] }
 0xd06   : > { %v2861_v1 = vpop.eup %2860 }
 0xd07   : > { %v1777_v0 = vmul.f32 %v2861_v1, %v2859_v52  ;;  %v2740_v1 = vld [vmem:[%s3828_s16 + $0x68] sm:$0xff] }
 0xd09   : > { %2685 = vmatmul.msk.f32.vlgmr.msrb.gmra.mxu3 %vm993_vm5, %v1777_v0  ;;  %v2731_v0 = vld [vmem:[%s3832_s20 + $0x10] sm:$0xff] }
 0xd0a   : > { %2023 = vmatpush.msrb.mxu3 %v2713_v3 }
 0xd0c   : > { %2024 = vmatpush.msrb.mxu3 %v2712_v6 }
 0xd0e   : > { %2025 = vmatpush.msrb.mxu3 %v2711_v11 }
 0xd10   : > { %2026 = vmatpush.msrb.mxu3 %v2710_v12 }
 0xd11   : > { %2705 = vmatmul.msk.f32.vlgmr.msra.gmra.mxu3 %vm993_vm5, %v1832_v13  ;;  %v2828_v13 = vld [vmem:[%s3827_s15 + $0x3] ss:$0 sm:$0xff] }
 0xd19   : > { %2715 = vmatmul.msk.f32.vlgmr.msrb.gmra.mxu3 %vm862_vm0, %v3485_v31 }
 0xd8c   : > { %v1798_v18 = vpop.f32.mrf.mxu3 }
 0xd8d   : > { %2709 = vmatmul.msk.f32.vlgmr.msrb.gmra.mxu2 %vm993_vm5, %v1798_v18  ;;  %v2748_v18 = vld [vmem:[%s3830_s18 + $0x78] sm:$0xff] }
 0xd94   : > { %v1916_v19 = vpop.f32.mrf.mxu3 }
 0xd95   : > { %v1919_v20 = vsel %vm993_vm5, %v1916_v19, -inf }
 0xd96   : > { %1920 = vmax.xlane.f32.xlu2 %v1919_v20  ;;  %v2746_v20 = vld [vmem:[%s3830_s18 + $0x68] sm:$0xff] }
 0xd9c   : > { %v2028_v43 = vpop.f32.mrf.mxu3 }
 0xd9d   : > { %v2029_v47 = vadd.f32 %v2824_v42, %v2028_v43 }
 0xd9f   : > { %v2031_v50 = vmul.f32 0.35355338, %v2029_v47 }
 0xe09   : > { %v1921_v21 = vpop.xlane.xlu2 %1920 }
 0xe0a   : > { %v1922_v22 = vsub.f32 %v1916_v19, %v1921_v21  ;;  %v2747_v19 = vld [vmem:[%s3830_s18 + $0x70] sm:$0xff]  ;;  %v2745_v21 = vld [vmem:[%s3830_s18 + $0x60] sm:$0xff] }
 0xe0c   : > { %v1923_v23 = vmul.f32 1.442695, %v1922_v22 }
 0xe0e   : > { %2862 = vpow2.f32 %v1923_v23 }
 0xe10   : > { %v1998_v51 = vpop.f32.mrf.mxu2 }
 0xe14   : > { %v2863_v24 = vpop.eup %2862 }
 0xe15   : > { %v1925_v25 = vsel %vm993_vm5, %v2863_v24, 0.0 }
 0xe16   : > { %1926 = vadd.xlane.f32.xlu0 %v1925_v25 }
 0xe89   : > { %v1927_v30 = vpop.xlane.xlu0 %1926 }
 0xe8a   : > { %2864 = vrcp.f32 %v1927_v30 }
 0xe90   : > { %v2865_v32 = vpop.eup %2864 }
 0xe91   : > { %v1929_v33 = vmul.f32 %v2865_v32, %v2863_v24  ;;  %v2830_v32 = vld [vmem:[%s3831_s19 + $0x3] ss:$0 sm:$0xff] }
 0xe93   : > { %2706 = vmatmul.msk.f32.vlgmr.msra.gmra.mxu0 %vm993_vm5, %v1929_v33 }
 0xe94   : > { %2172 = vmatpush.msra.mxu0 %v2731_v0  ;;  %v2482_v0 = vld [vmem:[%s3838_s26 + $0x70] sm:$0xff] }
 0xe9b   : > { %2721 = vmatmul.msk.f32.vlgmr.msrb.gmra.mxu0 %vm862_vm0, %v3447_v4 }
 0xf10   : > { %v1950_v40 = vpop.f32.mrf.mxu0 }
 0xf11   : > { %2708 = vmatmul.msk.f32.vlgmr.msrb.gmra.mxu1 %vm993_vm5, %v1950_v40 }
 0xf12   : > { %2200 = vmatpush.msrb.mxu1 %v2736_v39  ;;  %v2831_v39 = vld [vmem:[%s3833_s21] ss:$0 sm:$0xff] }
 0xf14   : > { %2201 = vmatpush.msrb.mxu1 %v2735_v44 }
 0xf16   : > { %2202 = vmatpush.msrb.mxu1 %v2734_v41 }
 0xf18   : > { %v2059_v48 = vpop.f32.mrf.mxu0  ;;  %2203 = vmatpush.msrb.mxu1 %v2733_v46 }
 0xf19   : > { %v2060_v49 = vadd.f32 %v2826_v45, %v2059_v48  ;;  %2727 = vmatmul.msk.f32.vlgmr.msra.gmra.mxu1 %vm862_vm0, %v3447_v4 }
 0xf1b   : > { %2728 = vmatpush.xpose.msk.msra.mxu2 %vm993_vm5, %v2060_v49 }
 0xf1e   : > { %2729 = vmatmul.msk.f32.vlgmr.msra.gmra.mxu2 %vm993_vm5, %v2031_v50  ;;  %v2396_v50 = vld [vmem:[%s3836_s24 + $0x18] sm:$0xff] }
 0xf1f   : > { %2231 = vmatpush.msrb.mxu2 %v2742_v62 }
 0xf21   : > { %2738 = vmatmul.msk.f32.vlgmr.msrb.gmra.mxu1 %vm862_vm0, %v3485_v31  ;;  %2232 = vmatpush.msrb.mxu2 %v2741_v63 }
 0xf23   : > { %2233 = vmatpush.msrb.mxu2 %v2740_v1 }
 0xf25   : > { %2234 = vmatpush.msrb.mxu2 %v2739_v2  ;;  %v2483_v2 = vld [vmem:[%s3838_s26 + $0x78] sm:$0xff] }
 0xf26   : > { %2744 = vmatmul.msk.f32.vlgmr.msrb.gmra.mxu2 %vm862_vm0, %v3447_v4 }
 0xf27   : > { %2349 = vmatpush.msra.mxu2 %v2754_v34 }
 0xf8e   : > { %v1975_v52 = vpop.f32.mrf.mxu1 }
 0xf8f   : > { %v1999_v9 = vadd.f32 %v1998_v51, %v1975_v52  ;;  %v2394_v51 = vld [vmem:[%s3836_s24 + $0x8] sm:$0xff]  ;;  %v2393_v52 = vld [vmem:[%s3836_s24] sm:$0xff] }
 0xf96   : > { %v2089_v53 = vpop.f32.mrf.mxu1 }
 0xf97   : > { %v2090_v54 = vadd.f32 %v2827_v10, %v2089_v53 }
 0xf99   : > { %2147 = vmatpush.msra.mxu3 %v2090_v54 }
 0xf9b   : > { %2261 = vmatpush.msrb.mxu3 %v2748_v18 }
 0xf9d   : > { %2262 = vmatpush.msrb.mxu3 %v2747_v19  ;;  %v2475_v19 = vld [vmem:[%s3838_s26 + $0x38] sm:$0xff] }
 0xf9e   : > { %v2205_v14 = vpop.f32.mrf.mxu1 }
 0xf9f   : > { %v2206_v16 = vadd.f32 %v2828_v13, %v2205_v14  ;;  %2263 = vmatpush.msrb.mxu3 %v2746_v20  ;;  %v2478_v13 = vld [vmem:[%s3838_s26 + $0x50] sm:$0xff] }
 0xfa1   : > { %v2115_v55 = vpop.f32.mrf.mxu2  ;;  %v2208_v17 = vmul.f32 0.35355338, %v2206_v16  ;;  %2264 = vmatpush.msrb.mxu3 %v2745_v21 }
 0xfa2   : > { %v2118_v56 = vsel %vm993_vm5, %v2115_v55, -inf }
 0xfa3   : > { %2119 = vmax.xlane.f32.xlu1 %v2118_v56 }
 0xfa9   : > { %v2236_v11 = vpop.f32.mrf.mxu2 }
 0xfaa   : > { %v2237_v12 = vadd.f32 %v2829_v7, %v2236_v11  ;;  %v2479_v7 = vld [vmem:[%s3838_s26 + $0x58] sm:$0xff] }
 0xfac   : > { %2751 = vmatpush.xpose.msk.msrb.mxu0 %vm993_vm5, %v2237_v12 }
0x1016   : > { %v2120_v57 = vpop.xlane.xlu1 %2119 }
0x1017   : > { %v2121_v59 = vsub.f32 %v2115_v55, %v2120_v57 }
0x1019   : > { %v2122_v60 = vmul.f32 1.442695, %v2121_v59 }
0x101b   : > { %2866 = vpow2.f32 %v2122_v60 }
0x1021   : > { %v2867_v61 = vpop.eup %2866 }
0x1022   : > { %v2124_v31 = vsel %vm993_vm5, %v2867_v61, 0.0 }
0x1023   : > { %2125 = vadd.xlane.f32.xlu2 %v2124_v31 }
0x1096   : > { %v2126_v3 = vpop.xlane.xlu2 %2125 }
0x1097   : > { %2868 = vrcp.f32 %v2126_v3  ;;  %v2481_v3 = vld [vmem:[%s3838_s26 + $0x68] sm:$0xff] }
0x109d   : > { %v2869_v5 = vpop.eup %2868 }
0x109e   : > { %v2128_v6 = vmul.f32 %v2869_v5, %v2867_v61  ;;  %v2832_v61 = vld [vmem:[%s3834_s22] ss:$0 sm:$0xff] }
0x109f   : > { %v2834_v5 = vld [vmem:[%s3909_s25] ss:$0 sm:$0xff] }
0x10a0   : > { %2730 = vmatmul.msk.f32.vlgmr.msra.gmra.mxu3 %vm993_vm5, %v2128_v6  ;;  %v2480_v6 = vld [vmem:[%s3838_s26 + $0x60] sm:$0xff] }
0x10a1   : > { %2416 = vmatpush.msra.mxu3 %v2396_v50 }
0x10a8   : > { %2750 = vmatmul.msk.f32.vlgmr.msrb.gmra.mxu3 %vm862_vm0, %v3447_v4 }
0x1123   : > { %v2149_v15 = vpop.f32.mrf.mxu3 }
0x1124   : > { %2732 = vmatmul.msk.f32.vlgmr.msra.gmra.mxu0 %vm993_vm5, %v2149_v15  ;;  %v2477_v15 = vld [vmem:[%s3838_s26 + $0x48] sm:$0xff] }
0x1125   : > { %2488 = vmatpush.msra.mxu0 %v2483_v2 }
0x1127   : > { %2489 = vmatpush.msra.mxu0 %v2482_v0 }
0x1129   : > { %2490 = vmatpush.msra.mxu0 %v2481_v3 }
0x112b   : > { %v2266_v33 = vpop.f32.mrf.mxu3  ;;  %2491 = vmatpush.msra.mxu0 %v2480_v6 }
0x112c   : > { %2752 = vmatmul.msk.f32.vlgmr.msrb.gmra.mxu0 %vm993_vm5, %v2208_v17  ;;  %v2267_v4 = vadd.f32 %v2830_v32, %v2266_v33  ;;  %v2476_v17 = vld [vmem:[%s3838_s26 + $0x40] sm:$0xff] }
0x112d   : > { %2492 = vmatpush.msra.mxu0 %v2479_v7 }
0x112e   : > { %2324 = vmatpush.msra.mxu1 %v2267_v4  ;;  %v2470_v4 = vld [vmem:[%s3838_s26 + $0x10] sm:$0xff] }
0x112f   : > { %2493 = vmatpush.msra.mxu0 %v2478_v13 }
0x1131   : > { %2494 = vmatpush.msra.mxu0 %v2477_v15 }
0x1133   : > { %2495 = vmatpush.msra.mxu0 %v2476_v17 }
0x1135   : > { %2496 = vmatpush.msra.mxu0 %v2475_v19 }
0x11a1   : > { %v2174_v22 = vpop.f32.mrf.mxu0 }
0x11a2   : > { %v2177_v23 = vadd.f32 %v2174_v22, %v1999_v9  ;;  %v2474_v22 = vld [vmem:[%s3838_s26 + $0x30] sm:$0xff] }
0x11a3   : > { %2497 = vmatpush.msra.mxu0 %v2474_v22 }
0x11a9   : > { %v2292_v24 = vpop.f32.mrf.mxu0 }
0x11aa   : > { %v2295_v25 = vsel %vm993_vm5, %v2292_v24, -inf }
0x11ab   : > { %2296 = vmax.xlane.f32.xlu0 %v2295_v25  ;;  %v2473_v25 = vld [vmem:[%s3838_s26 + $0x28] sm:$0xff] }
0x11ac   : > { %2498 = vmatpush.msra.mxu0 %v2473_v25 }
0x121e   : > { %v2297_v26 = vpop.xlane.xlu0 %2296 }
0x121f   : > { %v2298_v27 = vsub.f32 %v2292_v24, %v2297_v26 }
0x1221   : > { %v2299_v28 = vmul.f32 1.442695, %v2298_v27 }
0x1223   : > { %2870 = vpow2.f32 %v2299_v28  ;;  %v2472_v28 = vld [vmem:[%s3838_s26 + $0x20] sm:$0xff] }
0x1224   : > { %2499 = vmatpush.msra.mxu0 %v2472_v28 }
0x1229   : > { %v2871_v29 = vpop.eup %2870 }
0x122a   : > { %v2301_v30 = vsel %vm993_vm5, %v2871_v29, 0.0 }
0x122b   : > { %2302 = vadd.xlane.f32.xlu1 %v2301_v30  ;;  %v2471_v30 = vld [vmem:[%s3838_s26 + $0x18] sm:$0xff] }
0x122c   : > { %2500 = vmatpush.msra.mxu0 %v2471_v30 }
0x122e   : > { %2501 = vmatpush.msra.mxu0 %v2470_v4 }
0x129e   : > { %v2303_v35 = vpop.xlane.xlu1 %2302 }
0x129f   : > { %2872 = vrcp.f32 %v2303_v35  ;;  %v2469_v35 = vld [vmem:[%s3838_s26 + $0x8] sm:$0xff] }
0x12a0   : > { %2502 = vmatpush.msra.mxu0 %v2469_v35 }
0x12a5   : > { %v2873_v36 = vpop.eup %2872 }
0x12a6   : > { %v2305_v37 = vmul.f32 %v2873_v36, %v2871_v29 }
0x12a8   : > { %2753 = vmatmul.msk.f32.vlgmr.msra.gmra.mxu1 %vm993_vm5, %v2305_v37  ;;  %v2468_v37 = vld [vmem:[%s3838_s26] sm:$0xff] }
0x12a9   : > { %2503 = vmatpush.msra.mxu0 %v2468_v37 }
0x1325   : > { %v2326_v38 = vpop.f32.mrf.mxu1 }
0x1326   : > { %2755 = vmatmul.msk.f32.vlgmr.msra.gmra.mxu2 %vm993_vm5, %v2326_v38 }
0x13a9   : > { %v2351_v40 = vpop.f32.mrf.mxu2 }
0x13aa   : > { %v2354_v44 = vadd.f32 %v2351_v40, %v2177_v23 }
0x13ac   : > { %v2359_v41 = vadd.f32 %v2831_v39, %v2354_v44 }
0x13ae   : > { %v3693_v42 = vadd.f32 %v2359_v41, %v3426_v58  ;;  %v2395_v58 = vld [vmem:[%s3836_s24 + $0x10] sm:$0xff] }
0x13af   : > { %2417 = vmatpush.msra.mxu3 %v2395_v58 }
0x13b0   : > { %v2363_v43 = vsel %vm862_vm0, %v3693_v42, 0.0 }
0x13b1   : > { %2364 = vadd.xlane.f32.xlu2 %v2363_v43  ;;  %2418 = vmatpush.msra.mxu3 %v2394_v51 }
0x13b3   : > { %2419 = vmatpush.msra.mxu3 %v2393_v52 }
0x1424   : > { %v2365_v45 = vpop.xlane.xlu2 %2364 }
0x1425   : > { %v2366_v46 = vmul.f32 %v2365_v45, %v3150_v8 }
0x1427   : > { %v2367_v47 = vsub.f32 %v3693_v42, %v2366_v46 }
0x1429   : > { %v2368_v48 = vmul.f32 %v2367_v47, %v2367_v47 }
0x142b   : > { %v2369_v49 = vsel %vm862_vm0, %v2368_v48, 0.0 }
0x142c   : > { %2370 = vadd.xlane.f32.xlu0 %v2369_v49 }
0x149f   : > { %v2371_v9 = vpop.xlane.xlu0 %2370 }
0x14a0   : > { %v2372_v10 = vmul.f32 %v2371_v9, %v3150_v8  ;;  %v2833_v8 = vld [vmem:[%s3835_s23] ss:$0 sm:$0xff] }
0x14a2   : > { %v2373_v53 = vadd.f32 1e-05, %v2372_v10 }
0x14a4   : > { %2874 = vrsqrt.f32 %v2373_v53  ;;  %vm2380_vm11 = vweird.f32 %v2373_v53 }
0x14aa   : > { %v2875_v54 = vpop.eup %2874 }
0x14ab   : > { %v2375_v55 = vmul.f32 %v2875_v54, %v2373_v53  ;;  %vm2381_vm10 = vweird.f32 %v2875_v54 }
0x14ac   : > { %vm2382_vm12 = vmor %vm2380_vm11, %vm2381_vm10 }
0x14ad   : > { %v2376_v56 = vmul.f32 %v2875_v54, %v2375_v55 }
0x14af   : > { %v2377_v57 = vmul.f32 0.5, %v2376_v56 }
0x14b1   : > { %v2378_v59 = vsub.f32 1.5, %v2377_v57 }
0x14b3   : > { %v2379_v60 = vmul.f32 %v2875_v54, %v2378_v59 }
0x14b5   : > { %v2383_v31 = vsel %vm2382_vm12, %v2875_v54, %v2379_v60 }
0x14b6   : > { %v2384_v62 = vmul.f32 %v2383_v31, %v2367_v47  ;;  %v2835_v31 = vld [vmem:[%s3912_s27] ss:$0 sm:$0xff] }
0x14b8   : > { %v2388_v63 = vmul.f32 %v2832_v61, %v2384_v62 }
0x14ba   : > { %v2392_v1 = vadd.f32 %v2833_v8, %v2388_v63 }
0x14bc   : > { %2756 = vmatmul.msk.f32.vlgmr.msra.gmra.mxu3 %vm862_vm0, %v2392_v1 }
0x153f   : > { %v2421_v11 = vpop.f32.mrf.mxu3 }
0x1540   : > { %v3738_v12 = vadd.f32 %v2834_v5, %v2421_v11 }
0x1542   : > { %v2425_v14 = vmul.f32 0.70710677, %v3738_v12  ;;  %v2424_v59 = vmul.f32 0.5, %v3738_v12 }
0x1544   : > { %v2426_v16 = vmul.f32 %v2425_v14, %v2425_v14 }
0x1546   : > { %v2427_v18 = vmin.f32 %v2426_v16, 16.0 }
0x1548   : > { %v2428_v20 = vmul.f32 2.1237322e-06, %v2427_v18  ;;  %v2439_v21 = vmul.f32 3.8918573e-05, %v2427_v18 }
0x154a   : > { %v2429_v23 = vadd.f32 0.00028619796, %v2428_v20  ;;  %v2440_v24 = vadd.f32 0.001143296, %v2439_v21 }
0x154c   : > { %v2430_v26 = vmul.f32 %v2429_v23, %v2427_v18  ;;  %v2441_v27 = vmul.f32 %v2440_v24, %v2427_v18 }
0x154e   : > { %v2442_v29 = vadd.f32 0.014752088, %v2441_v27  ;;  %v2431_v32 = vadd.f32 0.0036580483, %v2430_v26 }
0x1550   : > { %v2443_v33 = vmul.f32 %v2442_v29, %v2427_v18  ;;  %v2432_v36 = vmul.f32 %v2431_v32, %v2427_v18 }
0x1552   : > { %v2444_v34 = vadd.f32 0.112945676, %v2443_v33  ;;  %v2433_v40 = vadd.f32 0.05243302, %v2432_v36 }
0x1554   : > { %v2445_v38 = vmul.f32 %v2444_v34, %v2427_v18  ;;  %v2434_v43 = vmul.f32 %v2433_v40, %v2427_v18 }
0x1556   : > { %v2446_v39 = vadd.f32 0.4994258, %v2445_v38  ;;  %v2435_v45 = vadd.f32 0.18741608, %v2434_v43 }
0x1558   : > { %v2447_v44 = vmul.f32 %v2446_v39, %v2427_v18  ;;  %v2436_v47 = vmul.f32 %v2435_v45, %v2427_v18 }
0x155a   : > { %v2448_v41 = vadd.f32 1.0, %v2447_v44  ;;  %v2437_v58 = vadd.f32 1.1283791, %v2436_v47 }
0x155c   : > { %2876 = vrcp.f32 %v2448_v41  ;;  %v2460_v50 = vand.u32 2147483648, %v2448_v41  ;;  %v2458_v52 = vand.u32 2147483647, %v2448_v41  ;;  %vm2454_vm14 = vweird.f32 %v2448_v41 }
0x155d   : > { %v2438_v53 = vmul.f32 %v2437_v58, %v2425_v14 }
0x155e   : > { %v2461_v10 = vor.u32 1.1754944e-38, %v2460_v50  ;;  %vm2459_vm1 = vcmp.eq.f32.partialorder %v2458_v52, 8.507059e+37 }
0x1562   : > { %v2877_v46 = vpop.eup %2876 }
0x1563   : > { %v2450_v48 = vmul.f32 %v2877_v46, %v2448_v41  ;;  %vm2455_vm13 = vweird.f32 %v2877_v46 }
0x1564   : > { %vm2456_vm15 = vmor %vm2454_vm14, %vm2455_vm13 }
0x1565   : > { %v2451_v49 = vsub.f32 1.0, %v2450_v48 }
0x1567   : > { %v2452_v51 = vmul.f32 %v2877_v46, %v2451_v49 }
0x1569   : > { %v2453_v9 = vadd.f32 %v2877_v46, %v2452_v51 }
0x156b   : > { %v2457_v54 = vsel %vm2456_vm15, %v2877_v46, %v2453_v9 }
0x156c   : > { %v2462_v55 = vsel %vm2459_vm1, %v2461_v10, %v2457_v54 }
0x156d   : > { %v2463_v56 = vmul.f32 %v2462_v55, %v2438_v53 }
0x156f   : > { %v2757_v57 = vclamps-f32 %v2463_v56, 1.0 }
0x1571   : > { %v2466_v60 = vadd.f32 1.0, %v2757_v57 }
0x1573   : > { %v2467_v61 = vmul.f32 %v2466_v60, %v2424_v59 }
0x1575   : > { %2504 = vmatmul.f32.vlgmr.msra.gmra.mxu0 %v2467_v61 }
0x15f2   : > { %v2505_v62 = vpop.f32.mrf.mxu0 }
0x15f3   : > { %v2506_v8 = vadd.f32 %v2835_v31, %v2505_v62 }
0x15f5   : > { %v2508_v63 = vadd.f32 %v2506_v8, %v3693_v42 }
0x15f7   : > { %2509 = vst.msk [vmem:[%s849_s4] sm:$0xff] %vm862_vm0, %v2508_v63 }
0x15f8   : > { %2905 = shalt.err (!%p2902_p3)
}
0x15f9   : > { %2762 = dma.vmem_to_hbm [thread:$0]  (%p3126_p5), %s2524_s6, 128, %s2526_s7, %s2511_s30  }
0x15fa PF: > { %s3915_s4 = sld [smem:[#allocation8_spill]] }
0x15fb   : > { %s3916_s9 = sld [smem:[#allocation5_spill]] }
0x1600   : > { %p2768_p4 = scmp.ge.s32.totalorder %s3915_s4, 2 }
0x1601   : > { %s2537_s25 = sand.u32 1, %s3916_s9  }
0x1602   : > { %p2765_p7 = pnand %p2768_p4, %p3130_p6  ;;  %s2538_s8 = scalar_lea.sflag [#allocation3], %s2537_s25 }
0x1604   : > { %p2766_p8 = pneg %p2765_p7 }
0x1606   : > { %2923 = dma.done.wait (%p2766_p8), %s2538_s8, 128  }
0x1607   : > { %2925 = vsyncadd (%p2766_p8), %s2538_s8, 4294967168  ;;  %s3918_s30 = sld [smem:[#allocation10_spill]] }
0x1608   : > { %s3919_s8 = sld [smem:[#allocation6_spill]] }
0x1609   : > { %s3920_s5 = sld [smem:[#allocation7_spill]] }
0x160a   : > { %s3921_s9 = sld [smem:[#allocation11_spill]] }
0x160d   : > { %p38_p9 = scmp.ge.s32.totalorder %s3918_s30, 4  }
0x160f   :  { %40 = sbr.rel (!%p38_p9) target bundleno = 20 (0x14), region = 212 }
0x1614   :  { %2544 = vsyncpa [#allocation3], 1 }
0x1615   :  { %2546 = vsyncpa [#allocation3 + $0x1], 1 }

</bundles_post_ra>
